<compile_context>
chip_gen: v7x
topology: tpu7x:2x2x1
jax: 0.10.0
libtpu: 0.0.40
codegen_flags: <defaults>
</compile_context>

<pallas_src>
import functools

import jax
import jax.numpy as jnp
import numpy as np
from jax.experimental import pallas as pl
from jax.experimental.pallas import tpu as pltpu  # noqa: F401  (kept for TPU-specific tuning)

B, N = 2, 8
NODE_DIM, COND_DIM, EDGE_DIM = 32, 32, 32
HALF = EDGE_DIM // 2
TOPK = 4


def _round8(v):
    return (v + 7) // 8 * 8


def _slab_offsets(node_dim, cond_dim, edge_dim, half):
    """8-row-aligned static offsets of every weight inside the packed weight slab."""
    r_wj = 0                                  # fused joint proj  (edge_dim, 2*edge_dim)
    r_wn = r_wj + _round8(edge_dim)           # node proj         (node_dim, edge_dim)
    r_wq = r_wn + _round8(node_dim)           # q proj            (cond_dim, edge_dim)
    r_wla = r_wq + _round8(cond_dim)          # linear_l top      (edge_dim, edge_dim)
    r_wlb = r_wla + _round8(edge_dim)         # linear_l bottom   (edge_dim, edge_dim)
    r_w1 = r_wlb + _round8(edge_dim)          # logit layer 1     (edge_dim, half)
    r_w2 = r_w1 + _round8(edge_dim)           # logit layer 2^T   (half, 1)
    rows = r_w2 + _round8(half)
    return r_wj, r_wn, r_wq, r_wla, r_wlb, r_w1, r_w2, rows


def _graph_learner_kernel(x_ref, cond_ref, w_ref, b_ref, ef_ref, ewtk_ref,
                          *, nb, nn, edge_dim, half, topk):
    E, H = edge_dim, half
    dn = x_ref.shape[1]
    dc = cond_ref.shape[1]
    r_wj, r_wn, r_wq, r_wla, r_wlb, r_w1, r_w2, _ = _slab_offsets(dn, dc, E, H)

    # --- static slab slices (sublane/lane aligned, zero runtime cost) ---
    wj = w_ref[r_wj:r_wj + E, 0:2 * E]          # [Wj_top | Wj_bot]      (E, 2E)
    wn = w_ref[r_wn:r_wn + dn, 0:E]             # node_proj              (dn, E)
    wq = w_ref[r_wq:r_wq + dc, 0:E]             # q_proj                 (dc, E)
    wla = w_ref[r_wla:r_wla + E, 0:E]           # linear_l (joint part)  (E, E)
    wlb = w_ref[r_wlb:r_wlb + E, 0:E]           # linear_l (q part)      (E, E)
    w1 = w_ref[r_w1:r_w1 + E, 0:H]              # logit layer 1          (E, H)
    w2c = w_ref[r_w2:r_w2 + H, 0:1]             # logit layer 2 (column) (H, 1)
    bn = b_ref[0:1, 0:E]
    bj = b_ref[1:2, 0:E]
    bq = b_ref[2:3, 0:E]
    bl = b_ref[3:4, 0:E]
    b1 = b_ref[4:5, 0:H]

    # --- EdgeFeatCat.node_proj_l : Linear(node_dim->E) + ReLU, all batches at once ---
    h = jnp.maximum(
        jnp.dot(x_ref[...], wn, preferred_element_type=jnp.float32) + bn, 0.0)   # (B*N, E)

    # --- node_intersect('cat') + joint_proj_l.
    #     cat([h_i, h_j]) @ Wj == h_i @ Wj_top + h_j @ Wj_bot: ONE fused matmul against the
    #     packed (E, 2E) block, then sliced.  bj is folded into the node-i part (added N
    #     times instead of N*N).  Batched broadcast form (leading dims only, no concats). ---
    ac = jnp.dot(h, wj, preferred_element_type=jnp.float32)                      # (B*N, 2E)
    a = ac[:, :E] + bj                                                           # node-i part
    c = ac[:, E:]                                                                # node-j part
    joint = jnp.maximum(
        a.reshape(nb, nn, 1, E) + c.reshape(nb, 1, nn, E), 0.0
    ).reshape(nb * nn * nn, E)                                                   # (B*N*N, E)

    # --- q_proj_l on cond; fold q @ Wl_bot + bl into one per-batch bias row ---
    q = jnp.maximum(
        jnp.dot(cond_ref[...], wq, preferred_element_type=jnp.float32) + bq, 0.0)  # (B, E)
    bias_ef = jnp.dot(q, wlb, preferred_element_type=jnp.float32) + bl              # (B, E)

    # --- linear_l on cat(joint, q): concat split into two matmuls, batched bias add ---
    ef_mm = jnp.dot(joint, wla, preferred_element_type=jnp.float32)              # (B*N*N, E)
    ef = jnp.maximum(
        ef_mm.reshape(nb, nn * nn, E) + bias_ef.reshape(nb, 1, E), 0.0
    ).reshape(nb * nn * nn, E)
    ef_ref[...] = ef.astype(ef_ref.dtype)

    # --- EdgeWeightLayer ('cond'): logit MLP  E -> E/2 -> 1, both layers on the MXU ---
    l1 = jnp.maximum(
        jnp.dot(ef, w1, preferred_element_type=jnp.float32) + b1, 0.0)           # (B*N*N, H)
    logits = jnp.dot(l1, w2c, preferred_element_type=jnp.float32).reshape(nb * nn, nn)
    # (scalar logit bias b2 deliberately dropped: softmax is shift-invariant and raw
    #  logits are never emitted, so the add was a mathematical no-op.)

    # --- softmax normalisation over each node's N neighbours (divide -> EUP reciprocal) ---
    m = jnp.max(logits, axis=-1, keepdims=True)
    e = jnp.exp(logits - m)
    w = e * pl.reciprocal(jnp.sum(e, axis=-1, keepdims=True), approx=True)       # (B*N, N)

    # --- fused top-k (sorted weights, descending), accumulated in registers ---
    idxf = jax.lax.broadcasted_iota(jnp.int32, w.shape, 1).astype(jnp.float32)
    big = jnp.float32(nn)
    neg_inf = jnp.float32(-jnp.inf)
    cur = w
    cols = [w]
    for t in range(topk):                     # tiny & static -> unrolled VPU passes
        mv = jnp.max(cur, axis=-1, keepdims=True)                                # (B*N, 1)
        cols.append(mv)
        if t + 1 < topk:
            # knock out only the first (lowest-index) max -> matches lax.top_k tie order
            hit = jnp.min(jnp.where(cur == mv, idxf, big), axis=-1, keepdims=True)
            cur = jnp.where(idxf == hit, neg_inf, cur)
    # one lane-dense store of [softmax weights | sorted top-k weights]
    ewtk_ref[...] = jnp.concatenate(cols, axis=-1).astype(ewtk_ref.dtype)
    # TODO(synk): EdgeTopK in the original repo also returns neighbour indices; only the
    # sorted top-k weights are emitted here.


@jax.jit
def graph_learner(node_feats, cond_feats, w_slab, b_slab):
    nb, nn, dn = node_feats.shape
    E = EDGE_DIM
    x_flat = node_feats.reshape(nb * nn, dn)        # batch folded into the sublane axis
    cond = cond_feats.reshape(nb, -1)

    def vmem(shape):
        nd = len(shape)
        return pl.BlockSpec(shape, lambda *_: (0,) * nd)

    kernel = functools.partial(_graph_learner_kernel, nb=nb, nn=nn,
                               edge_dim=E, half=HALF, topk=TOPK)
    ef, ewtk = pl.pallas_call(
        kernel,
        in_specs=[vmem((nb * nn, dn)),              # node feats (batch flattened)
                  vmem(cond.shape),                 # cond feats
                  vmem(w_slab.shape),               # packed weight slab
                  vmem(b_slab.shape)],              # packed bias slab
        out_specs=(vmem((nb * nn * nn, E)),         # edge feats
                   vmem((nb * nn, nn + TOPK))),     # [softmax weights | top-k weights]
        out_shape=(jax.ShapeDtypeStruct((nb * nn * nn, E), jnp.float32),
                   jax.ShapeDtypeStruct((nb * nn, nn + TOPK), jnp.float32)),
    )(x_flat, cond, w_slab, b_slab)
    ew = ewtk[:, :nn].reshape(nb, nn, nn)
    tk = ewtk[:, nn:]
    return ef, ew, tk


def init_params(keys):
    E, H, s = EDGE_DIM, HALF, 0.1

    def w(k, din, dout):
        return jax.random.normal(k, (din, dout), jnp.float32) * s

    def bvec(k, d):
        return jax.random.normal(k, (1, d), jnp.float32) * 0.01

    wn = w(keys[0], NODE_DIM, E); bn = bvec(keys[1], E)
    wj = w(keys[2], 2 * E, E);    bj = bvec(keys[3], E)
    wq = w(keys[4], COND_DIM, E); bq = bvec(keys[5], E)
    wl = w(keys[6], 2 * E, E);    bl = bvec(keys[7], E)
    w1 = w(keys[8], E, H);        b1 = bvec(keys[9], H)
    w2 = jax.random.normal(keys[10], (1, H), jnp.float32) * s
    b2 = jax.random.normal(keys[11], (1, 1), jnp.float32) * 0.01
    return (wn, bn, wj[:E], wj[E:], bj, wq, bq, wl[:E], wl[E:], bl, w1, b1, w2, b2)


def pack_params(raw):
    """One-time param prep (outside the jitted forward): pack into two DMA slabs."""
    (wn, bn, wja, wjb, bj, wq, bq, wla, wlb, bl, w1, b1, w2, b2) = raw
    E, H = EDGE_DIM, HALF
    dn, dc = wn.shape[0], wq.shape[0]
    r_wj, r_wn, r_wq, r_wla, r_wlb, r_w1, r_w2, rows = _slab_offsets(dn, dc, E, H)

    w_slab = np.zeros((rows, 2 * E), np.float32)
    w_slab[r_wj:r_wj + E, :2 * E] = np.concatenate([np.asarray(wja), np.asarray(wjb)], axis=1)
    w_slab[r_wn:r_wn + dn, :E] = np.asarray(wn)
    w_slab[r_wq:r_wq + dc, :E] = np.asarray(wq)
    w_slab[r_wla:r_wla + E, :E] = np.asarray(wla)
    w_slab[r_wlb:r_wlb + E, :E] = np.asarray(wlb)
    w_slab[r_w1:r_w1 + E, :H] = np.asarray(w1)
    w_slab[r_w2:r_w2 + H, :1] = np.asarray(w2).T

    b_slab = np.zeros((8, E), np.float32)
    b_slab[0, :E] = np.asarray(bn)[0]
    b_slab[1, :E] = np.asarray(bj)[0]
    b_slab[2, :E] = np.asarray(bq)[0]
    b_slab[3, :E] = np.asarray(bl)[0]
    b_slab[4, :H] = np.asarray(b1)[0]
    # b2 is intentionally dropped (softmax shift invariance).
    return jnp.asarray(w_slab), jnp.asarray(b_slab)


def reference(node_feats, cond_feats, p):
    (wn, bn, wja, wjb, bj, wq, bq, wla, wlb, bl, w1, b1, w2, b2) = p
    Bn, n, _ = node_feats.shape
    E = EDGE_DIM
    relu = lambda t: jnp.maximum(t, 0.0)
    h = relu(node_feats @ wn + bn)                                     # (B, N, E)
    left = jnp.broadcast_to(h[:, :, None, :], (Bn, n, n, E))
    right = jnp.broadcast_to(h[:, None, :, :], (Bn, n, n, E))
    fusion = jnp.concatenate([left, right], -1).reshape(Bn * n * n, 2 * E)
    wj = jnp.concatenate([wja, wjb], axis=0)
    joint = relu(fusion @ wj + bj)                                     # (B*N*N, E)
    q = relu(cond_feats @ wq + bq)                                     # (B, E)
    jf = joint.reshape(Bn, n * n, E)
    cat = jnp.concatenate([jf, jnp.broadcast_to(q[:, None, :], (Bn, n * n, E))], -1)
    wl = jnp.concatenate([wla, wlb], axis=0)
    ef = relu(cat @ wl + bl)                                           # (B, N*N, E)
    l1 = relu(ef @ w1 + b1)
    logits = l1 @ w2.T + b2                                            # (B, N*N, 1)
    ew = jax.nn.softmax(logits.reshape(Bn, n, n), axis=-1)
    return ef.reshape(Bn * n * n, E), ew


if __name__ == "__main__":
    key = jax.random.PRNGKey(0)
    keys = jax.random.split(key, 20)
    node_feats = jax.random.normal(keys[0], (B, N, NODE_DIM), jnp.float32)
    cond_feats = jax.random.normal(keys[1], (B, COND_DIM), jnp.float32)
    raw_params = init_params(keys[2:])
    w_slab, b_slab = pack_params(raw_params)      # one-time packing, outside the forward

    ef, ew, topk_w = graph_learner(node_feats, cond_feats, w_slab, b_slab)
    jax.block_until_ready((ef, ew, topk_w))

    ef_ref, ew_ref = reference(node_feats, cond_feats, raw_params)
    topk_ref, _ = jax.lax.top_k(ew_ref.reshape(B * N, N), TOPK)

    assert jnp.allclose(ef, ef_ref, rtol=1e-3, atol=1e-3)
    assert jnp.allclose(ew, ew_ref, rtol=1e-3, atol=1e-3)
    assert jnp.allclose(topk_w, topk_ref, rtol=1e-3, atol=1e-3)

    print("KERNEL_OK")
</pallas_src>

<mosaic_0001>
module attributes {stable_mosaic.version = 11 : i64} {
  func.func @_graph_learner_kernel(%arg0: memref<16x32xf32, #tpu.memory_space<vmem>>, %arg1: memref<2x32xf32, #tpu.memory_space<vmem>>, %arg2: memref<208x64xf32, #tpu.memory_space<vmem>>, %arg3: memref<8x32xf32, #tpu.memory_space<vmem>>, %arg4: memref<128x32xf32, #tpu.memory_space<vmem>>, %arg5: memref<16x12xf32, #tpu.memory_space<vmem>>) attributes {dimension_semantics = [], scalar_prefetch = 0 : i64, scratch_operands = 0 : i64, tpu.core_type = #tpu.core_type<tc>} {
    %c0 = arith.constant 0 : index
    %c0_0 = arith.constant 0 : index
    %0 = vector.load %arg2[%c0, %c0_0] : memref<208x64xf32, #tpu.memory_space<vmem>>, vector<32x64xf32>
    %c32 = arith.constant 32 : index
    %c0_1 = arith.constant 0 : index
    %1 = vector.load %arg2[%c32, %c0_1] : memref<208x64xf32, #tpu.memory_space<vmem>>, vector<32x32xf32>
    %c64 = arith.constant 64 : index
    %c0_2 = arith.constant 0 : index
    %2 = vector.load %arg2[%c64, %c0_2] : memref<208x64xf32, #tpu.memory_space<vmem>>, vector<32x32xf32>
    %c96 = arith.constant 96 : index
    %c0_3 = arith.constant 0 : index
    %3 = vector.load %arg2[%c96, %c0_3] : memref<208x64xf32, #tpu.memory_space<vmem>>, vector<32x32xf32>
    %c128 = arith.constant 128 : index
    %c0_4 = arith.constant 0 : index
    %4 = vector.load %arg2[%c128, %c0_4] : memref<208x64xf32, #tpu.memory_space<vmem>>, vector<32x32xf32>
    %c160 = arith.constant 160 : index
    %c0_5 = arith.constant 0 : index
    %5 = vector.load %arg2[%c160, %c0_5] : memref<208x64xf32, #tpu.memory_space<vmem>>, vector<32x16xf32>
    %c192 = arith.constant 192 : index
    %c0_6 = arith.constant 0 : index
    %6 = vector.load %arg2[%c192, %c0_6] : memref<208x64xf32, #tpu.memory_space<vmem>>, vector<16x1xf32>
    %c0_7 = arith.constant 0 : index
    %c0_8 = arith.constant 0 : index
    %7 = vector.load %arg3[%c0_7, %c0_8] : memref<8x32xf32, #tpu.memory_space<vmem>>, vector<1x32xf32>
    %c1 = arith.constant 1 : index
    %c0_9 = arith.constant 0 : index
    %8 = vector.load %arg3[%c1, %c0_9] : memref<8x32xf32, #tpu.memory_space<vmem>>, vector<1x32xf32>
    %c2 = arith.constant 2 : index
    %c0_10 = arith.constant 0 : index
    %9 = vector.load %arg3[%c2, %c0_10] : memref<8x32xf32, #tpu.memory_space<vmem>>, vector<1x32xf32>
    %c3 = arith.constant 3 : index
    %c0_11 = arith.constant 0 : index
    %10 = vector.load %arg3[%c3, %c0_11] : memref<8x32xf32, #tpu.memory_space<vmem>>, vector<1x32xf32>
    %c4 = arith.constant 4 : index
    %c0_12 = arith.constant 0 : index
    %11 = vector.load %arg3[%c4, %c0_12] : memref<8x32xf32, #tpu.memory_space<vmem>>, vector<1x16xf32>
    %c0_13 = arith.constant 0 : index
    %c0_14 = arith.constant 0 : index
    %12 = vector.load %arg0[%c0_13, %c0_14] : memref<16x32xf32, #tpu.memory_space<vmem>>, vector<16x32xf32>
    %cst = arith.constant dense<0.000000e+00> : vector<16x32xf32>
    %13 = tpu.matmul %12, %1, %cst {dimension_numbers = #tpu.dot_dimension_numbers<[1], [0], [0], [1], [0, 0, 1, 1], [], []>} : vector<16x32xf32>, vector<32x32xf32>, vector<16x32xf32> -> vector<16x32xf32>
    %14 = vector.broadcast %7 : vector<1x32xf32> to vector<16x32xf32>
    %15 = arith.addf %13, %14 : vector<16x32xf32>
    %cst_15 = arith.constant 0.000000e+00 : f32
    %16 = vector.broadcast %cst_15 : f32 to vector<16x32xf32>
    %17 = arith.maximumf %15, %16 : vector<16x32xf32>
    %cst_16 = arith.constant dense<0.000000e+00> : vector<16x64xf32>
    %18 = tpu.matmul %17, %0, %cst_16 {dimension_numbers = #tpu.dot_dimension_numbers<[1], [0], [0], [1], [0, 0, 1, 1], [], []>} : vector<16x32xf32>, vector<32x64xf32>, vector<16x64xf32> -> vector<16x64xf32>
    %19 = vector.extract_strided_slice %18 {offsets = [0, 0], sizes = [16, 32], strides = [1, 1]} : vector<16x64xf32> to vector<16x32xf32>
    %20 = vector.broadcast %8 : vector<1x32xf32> to vector<16x32xf32>
    %21 = arith.addf %19, %20 : vector<16x32xf32>
    %22 = vector.extract_strided_slice %18 {offsets = [0, 32], sizes = [16, 32], strides = [1, 1]} : vector<16x64xf32> to vector<16x32xf32>
    %23 = vector.shape_cast %21 : vector<16x32xf32> to vector<2x8x1x32xf32>
    %24 = vector.shape_cast %22 : vector<16x32xf32> to vector<2x1x8x32xf32>
    %25 = vector.broadcast %23 : vector<2x8x1x32xf32> to vector<2x8x8x32xf32>
    %26 = vector.broadcast %24 : vector<2x1x8x32xf32> to vector<2x8x8x32xf32>
    %27 = arith.addf %25, %26 : vector<2x8x8x32xf32>
    %cst_17 = arith.constant 0.000000e+00 : f32
    %28 = vector.broadcast %cst_17 : f32 to vector<2x8x8x32xf32>
    %29 = arith.maximumf %27, %28 : vector<2x8x8x32xf32>
    %30 = vector.shape_cast %29 : vector<2x8x8x32xf32> to vector<128x32xf32>
    %c0_18 = arith.constant 0 : index
    %c0_19 = arith.constant 0 : index
    %31 = vector.load %arg1[%c0_18, %c0_19] : memref<2x32xf32, #tpu.memory_space<vmem>>, vector<2x32xf32>
    %cst_20 = arith.constant dense<0.000000e+00> : vector<2x32xf32>
    %32 = tpu.matmul %31, %2, %cst_20 {dimension_numbers = #tpu.dot_dimension_numbers<[1], [0], [0], [1], [0, 0, 1, 1], [], []>} : vector<2x32xf32>, vector<32x32xf32>, vector<2x32xf32> -> vector<2x32xf32>
    %33 = vector.broadcast %9 : vector<1x32xf32> to vector<2x32xf32>
    %34 = arith.addf %32, %33 : vector<2x32xf32>
    %cst_21 = arith.constant 0.000000e+00 : f32
    %35 = vector.broadcast %cst_21 : f32 to vector<2x32xf32>
    %36 = arith.maximumf %34, %35 : vector<2x32xf32>
    %cst_22 = arith.constant dense<0.000000e+00> : vector<2x32xf32>
    %37 = tpu.matmul %36, %4, %cst_22 {dimension_numbers = #tpu.dot_dimension_numbers<[1], [0], [0], [1], [0, 0, 1, 1], [], []>} : vector<2x32xf32>, vector<32x32xf32>, vector<2x32xf32> -> vector<2x32xf32>
    %38 = vector.broadcast %10 : vector<1x32xf32> to vector<2x32xf32>
    %39 = arith.addf %37, %38 : vector<2x32xf32>
    %cst_23 = arith.constant dense<0.000000e+00> : vector<128x32xf32>
    %40 = tpu.matmul %30, %3, %cst_23 {dimension_numbers = #tpu.dot_dimension_numbers<[1], [0], [0], [1], [0, 0, 1, 1], [], []>} : vector<128x32xf32>, vector<32x32xf32>, vector<128x32xf32> -> vector<128x32xf32>
    %41 = vector.shape_cast %40 : vector<128x32xf32> to vector<2x64x32xf32>
    %42 = vector.shape_cast %39 : vector<2x32xf32> to vector<2x1x32xf32>
    %43 = vector.broadcast %42 : vector<2x1x32xf32> to vector<2x64x32xf32>
    %44 = arith.addf %41, %43 : vector<2x64x32xf32>
    %cst_24 = arith.constant 0.000000e+00 : f32
    %45 = vector.broadcast %cst_24 : f32 to vector<2x64x32xf32>
    %46 = arith.maximumf %44, %45 : vector<2x64x32xf32>
    %47 = vector.shape_cast %46 : vector<2x64x32xf32> to vector<128x32xf32>
    %c0_25 = arith.constant 0 : index
    %c0_26 = arith.constant 0 : index
    %48 = vector.load %arg4[%c0_25, %c0_26] : memref<128x32xf32, #tpu.memory_space<vmem>>, vector<128x32xf32>
    tpu.vector_store %arg4[%c0_25, %c0_26], %47 {strides = array<i32>} : memref<128x32xf32, #tpu.memory_space<vmem>>, vector<128x32xf32>,
    %cst_27 = arith.constant dense<0.000000e+00> : vector<128x16xf32>
    %49 = tpu.matmul %47, %5, %cst_27 {dimension_numbers = #tpu.dot_dimension_numbers<[1], [0], [0], [1], [0, 0, 1, 1], [], []>} : vector<128x32xf32>, vector<32x16xf32>, vector<128x16xf32> -> vector<128x16xf32>
    %50 = vector.broadcast %11 : vector<1x16xf32> to vector<128x16xf32>
    %51 = arith.addf %49, %50 : vector<128x16xf32>
    %cst_28 = arith.constant 0.000000e+00 : f32
    %52 = vector.broadcast %cst_28 : f32 to vector<128x16xf32>
    %53 = arith.maximumf %51, %52 : vector<128x16xf32>
    %cst_29 = arith.constant dense<0.000000e+00> : vector<128x1xf32>
    %54 = tpu.matmul %53, %6, %cst_29 {dimension_numbers = #tpu.dot_dimension_numbers<[1], [0], [0], [1], [0, 0, 1, 1], [], []>} : vector<128x16xf32>, vector<16x1xf32>, vector<128x1xf32> -> vector<128x1xf32>
    %55 = vector.shape_cast %54 : vector<128x1xf32> to vector<16x8xf32>
    %cst_30 = arith.constant dense<0xFF800000> : vector<16xf32>
    %56 = vector.multi_reduction <maximumf>, %55, %cst_30 [1] : vector<16x8xf32> to vector<16xf32>
    %57 = vector.shape_cast %56 : vector<16xf32> to vector<16x1xf32>
    %58 = vector.broadcast %57 : vector<16x1xf32> to vector<16x8xf32>
    %59 = arith.subf %55, %58 : vector<16x8xf32>
    %60 = math.exp %59 : vector<16x8xf32>
    %cst_31 = arith.constant dense<0.000000e+00> : vector<16xf32>
    %61 = vector.multi_reduction <add>, %60, %cst_31 [1] : vector<16x8xf32> to vector<16xf32>
    %62 = vector.shape_cast %61 : vector<16xf32> to vector<16x1xf32>
    %63 = tpu.reciprocal %62 {approx = true} : vector<16x1xf32> -> vector<16x1xf32>
    %64 = vector.broadcast %63 : vector<16x1xf32> to vector<16x8xf32>
    %65 = arith.mulf %60, %64 : vector<16x8xf32>
    %66 = tpu.iota {dimensions = array<i32: 1>} : vector<16x8xi32>
    %67 = arith.sitofp %66 : vector<16x8xi32> to vector<16x8xf32>
    %cst_32 = arith.constant dense<0xFF800000> : vector<16xf32>
    %68 = vector.multi_reduction <maximumf>, %65, %cst_32 [1] : vector<16x8xf32> to vector<16xf32>
    %69 = vector.shape_cast %68 : vector<16xf32> to vector<16x1xf32>
    %70 = vector.broadcast %69 : vector<16x1xf32> to vector<16x8xf32>
    %71 = arith.cmpf oeq, %65, %70 : vector<16x8xf32>
    %cst_33 = arith.constant 8.000000e+00 : f32
    %72 = vector.broadcast %cst_33 : f32 to vector<16x8xf32>
    %73 = arith.select %71, %67, %72 : vector<16x8xi1>, vector<16x8xf32>
    %cst_34 = arith.constant dense<0x7F800000> : vector<16xf32>
    %74 = vector.multi_reduction <minimumf>, %73, %cst_34 [1] : vector<16x8xf32> to vector<16xf32>
    %75 = vector.shape_cast %74 : vector<16xf32> to vector<16x1xf32>
    %76 = vector.broadcast %75 : vector<16x1xf32> to vector<16x8xf32>
    %77 = arith.cmpf oeq, %67, %76 : vector<16x8xf32>
    %cst_35 = arith.constant 0xFF800000 : f32
    %78 = vector.broadcast %cst_35 : f32 to vector<16x8xf32>
    %79 = arith.select %77, %78, %65 : vector<16x8xi1>, vector<16x8xf32>
    %cst_36 = arith.constant dense<0xFF800000> : vector<16xf32>
    %80 = vector.multi_reduction <maximumf>, %79, %cst_36 [1] : vector<16x8xf32> to vector<16xf32>
    %81 = vector.shape_cast %80 : vector<16xf32> to vector<16x1xf32>
    %82 = vector.broadcast %81 : vector<16x1xf32> to vector<16x8xf32>
    %83 = arith.cmpf oeq, %79, %82 : vector<16x8xf32>
    %cst_37 = arith.constant 8.000000e+00 : f32
    %84 = vector.broadcast %cst_37 : f32 to vector<16x8xf32>
    %85 = arith.select %83, %67, %84 : vector<16x8xi1>, vector<16x8xf32>
    %cst_38 = arith.constant dense<0x7F800000> : vector<16xf32>
    %86 = vector.multi_reduction <minimumf>, %85, %cst_38 [1] : vector<16x8xf32> to vector<16xf32>
    %87 = vector.shape_cast %86 : vector<16xf32> to vector<16x1xf32>
    %88 = vector.broadcast %87 : vector<16x1xf32> to vector<16x8xf32>
    %89 = arith.cmpf oeq, %67, %88 : vector<16x8xf32>
    %cst_39 = arith.constant 0xFF800000 : f32
    %90 = vector.broadcast %cst_39 : f32 to vector<16x8xf32>
    %91 = arith.select %89, %90, %79 : vector<16x8xi1>, vector<16x8xf32>
    %cst_40 = arith.constant dense<0xFF800000> : vector<16xf32>
    %92 = vector.multi_reduction <maximumf>, %91, %cst_40 [1] : vector<16x8xf32> to vector<16xf32>
    %93 = vector.shape_cast %92 : vector<16xf32> to vector<16x1xf32>
    %94 = vector.broadcast %93 : vector<16x1xf32> to vector<16x8xf32>
    %95 = arith.cmpf oeq, %91, %94 : vector<16x8xf32>
    %cst_41 = arith.constant 8.000000e+00 : f32
    %96 = vector.broadcast %cst_41 : f32 to vector<16x8xf32>
    %97 = arith.select %95, %67, %96 : vector<16x8xi1>, vector<16x8xf32>
    %cst_42 = arith.constant dense<0x7F800000> : vector<16xf32>
    %98 = vector.multi_reduction <minimumf>, %97, %cst_42 [1] : vector<16x8xf32> to vector<16xf32>
    %99 = vector.shape_cast %98 : vector<16xf32> to vector<16x1xf32>
    %100 = vector.broadcast %99 : vector<16x1xf32> to vector<16x8xf32>
    %101 = arith.cmpf oeq, %67, %100 : vector<16x8xf32>
    %cst_43 = arith.constant 0xFF800000 : f32
    %102 = vector.broadcast %cst_43 : f32 to vector<16x8xf32>
    %103 = arith.select %101, %102, %91 : vector<16x8xi1>, vector<16x8xf32>
    %cst_44 = arith.constant dense<0xFF800000> : vector<16xf32>
    %104 = vector.multi_reduction <maximumf>, %103, %cst_44 [1] : vector<16x8xf32> to vector<16xf32>
    %105 = vector.shape_cast %104 : vector<16xf32> to vector<16x1xf32>
    %106 = tpu.concatenate %65, %69, %81, %93, %105 in 1 : vector<16x8xf32>, vector<16x1xf32>, vector<16x1xf32>, vector<16x1xf32>, vector<16x1xf32> -> vector<16x12xf32>
    %c0_45 = arith.constant 0 : index
    %c0_46 = arith.constant 0 : index
    %107 = vector.load %arg5[%c0_45, %c0_46] : memref<16x12xf32, #tpu.memory_space<vmem>>, vector<16x12xf32>
    tpu.vector_store %arg5[%c0_45, %c0_46], %106 {strides = array<i32>} : memref<16x12xf32, #tpu.memory_space<vmem>>, vector<16x12xf32>,
    return
  }
}

</mosaic_0001>

<bundles_post_ra>
// kernel: graph_learner.1
= control target key start
LH: loop header
LB: loop body
LE: loop exit
PB: predicated region body
PF: predicated region fallthrough
CT: control target
= control target key end

     0   :  { %vm56_vm0 = vcmask 261120   ;;  %v2687_v17 = vmov 0.0|0.0   ;;  %vm2688_vm1 = vmmov 0   ;;  %v2689_v20 = vmov 0.0   ;;  %s2690_s16 = smov 96   ;;  %s3477_s2 = inlined_call_operand.vmem [shape: f32[208,64], index: 2, kind: input, shape index: {}]   ;;  %s3478_s0 = inlined_call_operand.vmem [shape: f32[16,32], index: 0, kind: input, shape index: {}]   ;;  %s3479_s1 = inlined_call_operand.vmem [shape: f32[2,32], index: 1, kind: input, shape index: {}]   ;;  %s3480_s3 = inlined_call_operand.vmem [shape: f32[8,32], index: 3, kind: input, shape index: {}]   ;;  %s3481_s4 = inlined_call_operand.vmem [shape: f32[128,32], index: 4, kind: output, shape index: {0}]   ;;  %s3482_s5 = inlined_call_operand.vmem [shape: f32[16,12], index: 5, kind: output, shape index: {1}]  }
   0x1   :  { %v23_v0 = vld [vmem:[%s3477_s2 + $0x20] sm:$0xff]  ;;  %v24_v1 = vld [vmem:[%s3477_s2 + $0x28] sm:$0xff]  ;;  %v25_v2 = vld [vmem:[%s3477_s2 + $0x30] sm:$0xff]  ;;  %v2691_v52 = vmov 1966171168   ;;  %v233_v54 = vlaneseq  ;;  %vm1090_vm2 = vcmask 130048  }
   0x2   :  { %v2591_v3 = vpack.c.bf16 %v24_v1, %v23_v0  ;;  %v26_v4 = vld [vmem:[%s3477_s2 + $0x38] sm:$0xff]  ;;  %v50_v5 = vld [vmem:[%s3478_s0] sm:$0xff]  ;;  %v20_v8 = vld [vmem:[%s3477_s2 + $0x8] sm:$0xff]  ;;  %v231_v53 = vunpack.c.l.s4 %v2691_v52  ;;  %vm1414_vm3 = vcmask 1041409   ;;  %vm1416_vm4 = vcmask 1042434  }
   0x3   :  { %v2595_v6 = vpack.c.bf16 %v26_v4, %v25_v2  ;;  %2463 = vmatprep.mubr.msk.f32.mxu0 %vm56_vm0, %v50_v5  ;;  %v19_v7 = vld [vmem:[%s3477_s2] sm:$0xff]  ;;  %v51_v10 = vld [vmem:[%s3478_s0 + $0x8] sm:$0xff]  ;;  %v21_v11 = vld [vmem:[%s3477_s2 + $0x10] sm:$0xff]  ;;  %v2816_v56 = vshrl.u32 %v233_v54, 7  ;;  %vm1418_vm5 = vcmask 1043459   ;;  %vm1420_vm6 = vcmask 1044484  }
   0x4   :  { %2592 = vmatprep.subr.bf16.mxu0 %v2591_v3  ;;  %v2599_v9 = vpack.c.bf16 %v20_v8, %v19_v7  ;;  %v22_v12 = vld [vmem:[%s3477_s2 + $0x18] sm:$0xff]  ;;  %v27_v14 = vld [vmem:[%s3477_s2 + $0x40] sm:$0xff]  ;;  %v28_v15 = vld [vmem:[%s3477_s2 + $0x48] sm:$0xff]  ;;  %v232_v55 = vunpack.c.0.s8 %v231_v53  ;;  %vm1422_vm7 = vcmask 1045509   ;;  %vm1424_vm8 = vcmask 1046534  }
   0x5   :  { %2594 = vmatpush3.bf16.msra.mxu0 %v2591_v3  ;;  %v2603_v13 = vpack.c.bf16 %v22_v12, %v21_v11  ;;  %v29_v16 = vld [vmem:[%s3477_s2 + $0x50] sm:$0xff]  ;;  %v2608_v18 = vpack.c.bf16 %v28_v15, %v27_v14  ;;  %v30_v19 = vld [vmem:[%s3477_s2 + $0x58] sm:$0xff]  ;;  %v447_v22 = vld [vmem:[%s3479_s1] sm:$0x3]  ;;  %vm1426_vm9 = vcmask 1047559   ;;  %vm1437_vm10 = vcmask 64512  }
   0x6   :  { %2596 = vmatprep.subr.bf16.mxu0 %v2595_v6  ;;  %2600 = vmatprep.subr.bf16.mxu1 %v2599_v9  ;;  %v2611_v21 = vpack.c.bf16 %v30_v19, %v29_v16  ;;  %v2316_v23 = vld [vmem:[%s3480_s3] ss:$0 sm:$0xff]  ;;  %v36_v31 = vld [vmem:[%s3477_s2 + $0x88] sm:$0xff]  ;;  %v2322_v32 = vld [vmem:[%s3480_s3 + $0x2] ss:$0 sm:$0xff]  ;;  %v2822_v58 = vsub.s32 %v232_v55, %v2816_v56 }
   0x7   :  { %2602 = vmatpush3.bf16.msra.mxu1 %v2599_v9  ;;  %v35_v30 = vld [vmem:[%s3477_s2 + $0x80] sm:$0xff]  ;;  %v37_v36 = vld [vmem:[%s3477_s2 + $0x90] sm:$0xff]  ;;  %v38_v37 = vld [vmem:[%s3477_s2 + $0x98] sm:$0xff]  ;;  %v2833_v9 = vsub.s32 0, %v2816_v56 }
   0x8   :  { %2604 = vmatprep.subr.bf16.mxu1 %v2603_v13  ;;  %v2614_v34 = vpack.c.bf16 %v36_v31, %v35_v30  ;;  %v31_v38 = vld [vmem:[%s3477_s2 + $0x60] sm:$0xff]  ;;  %v32_v40 = vld [vmem:[%s3477_s2 + $0x68] sm:$0xff]  ;;  %v2617_v41 = vpack.c.bf16 %v38_v37, %v37_v36  ;;  %v33_v44 = vld [vmem:[%s3477_s2 + $0x70] sm:$0xff] }
   0x9   :  { %2598 = vmatpush3.bf16.msra.mxu0 %v2595_v6  ;;  %v2619_v42 = vpack.c.bf16 %v32_v40, %v31_v38  ;;  %v34_v45 = vld [vmem:[%s3477_s2 + $0x78] sm:$0xff]  ;;  %v39_v49 = vld [vmem:[%s3477_s2 + $0xa0] sm:$0xff]  ;;  %v40_v50 = vld [vmem:[%s3477_s2 + $0xa8] sm:$0xff] }
   0xa   :  { %2607 = vmatprep.subr.bf16.mxu0 %v2687_v17  ;;  %v2623_v46 = vpack.c.bf16 %v34_v45, %v33_v44  ;;  %v2812_v51 = vpack.c.bf16 %v40_v50, %v39_v49  ;;  %v2321_v57 = vld [vmem:[%s3480_s3 + $0x1] ss:$0 sm:$0xff]  ;;  %v41_v44 = vld [vmem:[%s3477_s2 + $0xb0] sm:$0xff]  ;;  %v42_v45 = vld [vmem:[%s3477_s2 + $0xb8] sm:$0xff] }
   0xb   :  { %2606 = vmatpush3.bf16.msra.mxu1 %v2603_v13 }
   0xc   :  { %2464 = vmatmul.mubr.msk.f32.vlgmr.msra.gmra.mrb[0].mxu0 %vm56_vm0, %v51_v10  ;;  %2613 = vmatprep.subr.bf16.mxu1 %v2687_v17 }
   0xd   :  { %2485 = vmatprep.mubr.msk.f32.mxu0 %vm2688_vm1, %v2689_v20  ;;  %2609 = vmatpush3.bf16.msra.mxu0 %v2608_v18 }
   0xe   :  { %2610 = vmatprep.subr.bf16.mxu0 %v2687_v17 }
  0x11   :  { %2612 = vmatpush3.bf16.msra.mxu0 %v2611_v21 }
  0x12   :  { %2620 = vmatprep.subr.bf16.mxu0 %v2619_v42 }
  0x14   :  { %2486 = vmatmul.mubr.msk.f32.vlgmr.msra.gmra.mrb[2].mxu0 %vm56_vm0, %v447_v22 }
  0x15   :  { %2622 = vmatpush3.bf16.msra.mxu0 %v2619_v42 }
  0x16   :  { %2624 = vmatprep.subr.bf16.mxu0 %v2623_v46 }
  0x19   :  { %2626 = vmatpush3.bf16.msra.mxu0 %v2623_v46 }
  0xdf   :  { %v2465_v24 = vpop.f32.mrb[0].mxu0 }
  0xe0   :  { %v135_v25 = vadd.f32 %v2465_v24, %v2316_v23  ;;  %v129_v26 = vpop.f32.mrb[1].mxu0 }
  0xe1   :  { %v130_v27 = vadd.f32 %v2316_v23, %v129_v26 }
  0xe2   :  { %v139_v29 = vmax.f32 %v135_v25, 0.0 }
  0xe3   :  { %v138_v28 = vmax.f32 %v130_v27, 0.0 }
  0xe5   :  { %2474 = vmatprep.mubr.msk.f32.mxu1 %vm56_vm0, %v138_v28 }
  0xe6   :  { %2475 = vmatmul.mubr.msk.f32.vlgmr.msra.gmra.mrb[0].mxu1 %vm56_vm0, %v139_v29 }
  0xe7   :  { %2496 = vmatprep.mubr.msk.f32.mxu1 %vm2688_vm1, %v2689_v20  ;;  %v521_v33 = vpop.f32.mrb[2].mxu0  ;;  %2615 = vmatpush3.bf16.msra.mxu1 %v2614_v34 }
  0xe8   :  { %v2487_v35 = vpop.f32.mrb[3].mxu0  ;;  %v522_v39 = vadd.f32 %v2322_v32, %v521_v33  ;;  %2616 = vmatprep.subr.bf16.mxu1 %v2687_v17 }
  0xea   :  { %v525_v43 = vmax.f32 %v522_v39, 0.0 }
  0xeb   :  { %2618 = vmatpush3.bf16.msra.mxu1 %v2617_v41 }
  0xec   :  { %2639 = vmatprep.subr.bf16.mxu1 %v2619_v42 }
  0xee   :  { %2497 = vmatmul.mubr.msk.f32.vlgmr.msra.gmra.mrb[2].mxu1 %vm56_vm0, %v525_v43 }
  0xef   :  { %2641 = vmatpush3.bf16.msra.mxu1 %v2619_v42 }
  0xf0   :  { %2640 = vmatprep.subr.bf16.mxu1 %v2623_v46 }
  0xf3   :  { %2642 = vmatpush3.bf16.msra.mxu1 %v2623_v46 }
  0xf4   :  { %2628 = vmatprep.subr.bf16.mxu1 %v2812_v51 }
 0x1b9   :  { %v2476_v47 = vpop.f32.mrb[0].mxu1 }
 0x1ba   :  { %v212_v48 = vpop.f32.mrb[1].mxu1  ;;  %v226_v60 = vadd.f32 %v2476_v47, %v2321_v57 }
 0x1bb   :  { %409 = vrot.lane.b32.xlu0 %v212_v48, %s2690_s16  ;;  %v225_v59 = vadd.f32 %v2321_v57, %v212_v48 }
 0x1bc   :  { %v285_v62 = vrot.slane %v226_v60, %v2822_v58  ;;  %v278_v4 = vcombine.high %v226_v60, %v226_v60 }
 0x1bd   :  { %v236_v61 = vrot.slane %v225_v59, %v2822_v58  ;;  %v229_v0 = vcombine.high %v225_v59, %v225_v59 }
 0x1be   :  { %v293_v5 = vcombine.high %v285_v62, %v285_v62  ;;  %v301_v8 = vrot.slane %v285_v62, %v2822_v58  ;;  %v292_v11 = vrot.slane %v278_v4, %v2822_v58 }
 0x1bf   :  { %411 = vrot.lane.b32.xlu0 %v2476_v47, %s2690_s16  ;;  %v244_v1 = vcombine.high %v236_v61, %v236_v61  ;;  %v252_v3 = vrot.slane %v236_v61, %v2822_v58  ;;  %v243_v6 = vrot.slane %v229_v0, %v2822_v58  ;;  %v2631_v61 = vpack.c.bf16 %v42_v45, %v41_v44 }
 0x1c0   :  { %v315_v12 = vrot.slane %v293_v5, %v2822_v58  ;;  %v323_v16 = vcombine.high %v301_v8, %v301_v8  ;;  %v294_v20 = vcombine.high %v292_v11, %v292_v11  ;;  %v308_v21 = vrot.slane %v292_v11, %v2822_v58 }
 0x1c1   :  { %v2826_v63 = vpop.f32.mrb[2].mxu1  ;;  %v266_v7 = vrot.slane %v244_v1, %v2822_v58  ;;  %v274_v10 = vcombine.high %v252_v3, %v252_v3  ;;  %v245_v13 = vcombine.high %v243_v6, %v243_v6  ;;  %v259_v14 = vrot.slane %v243_v6, %v2822_v58 }
 0x1c2   :  { %v2498_v2 = vpop.f32.mrb[3].mxu1  ;;  %v330_v17 = vrot.slane %v252_v3, %v2833_v9  ;;  %v362_v22 = vrot.slane %v301_v8, %v2833_v9  ;;  %v325_v24 = vcombine.high %v315_v12, %v315_v12  ;;  %v366_v28 = vrot.slane %v315_v12, %v2833_v9 }
 0x1c3   :  { %v276_v15 = vcombine.high %v266_v7, %v266_v7  ;;  %v334_v18 = vrot.slane %v266_v7, %v2833_v9  ;;  %v338_v19 = vrot.slane %v274_v10, %v2833_v9  ;;  %v273_v29 = vrot.slane %v245_v13, %v2822_v58 }
 0x1c4   :  { %v346_v30 = vrot.slane %v259_v14, %v2833_v9  ;;  %v370_v32 = vrot.slane %v323_v16, %v2833_v9  ;;  %v275_v33 = vcombine.high %v259_v14, %v259_v14  ;;  %v322_v36 = vrot.slane %v294_v20, %v2822_v58  ;;  %v43_v20 = vld [vmem:[%s3477_s2 + $0xc0] sm:$0xff] }
 0x1c5   :  { %v342_v31 = vrot.slane %v276_v15, %v2833_v9  ;;  %v324_v46 = vcombine.high %v308_v21, %v308_v21  ;;  %v277_v47 = vcombine.high %v273_v29, %v273_v29  ;;  %v350_v48 = vrot.slane %v273_v29, %v2833_v9 }
 0x1c6   :  { %v374_v49 = vrot.slane %v325_v24, %v2833_v9  ;;  %v378_v50 = vrot.slane %v308_v21, %v2833_v9  ;;  %v354_v55 = vrot.slane %v275_v33, %v2833_v9  ;;  %v326_v3 = vcombine.high %v322_v36, %v322_v36  ;;  %v44_v21 = vld [vmem:[%s3477_s2 + $0xc8] sm:$0xff] }
 0x1c7   :  { %v358_v4 = vrot.slane %v277_v47, %v2833_v9  ;;  %v382_v5 = vrot.slane %v322_v36, %v2833_v9  ;;  %v386_v6 = vrot.slane %v324_v46, %v2833_v9 }
 0x1c8   :  { %v390_v15 = vrot.slane %v326_v3, %v2833_v9 }
 0x22d   :  { %v410_v23 = vpop.permute.xlu0 %409 }
 0x22e   :  { %v415_v25 = vadd.f32 %v410_v23, %v330_v17  ;;  %v416_v26 = vadd.f32 %v410_v23, %v334_v18  ;;  %v417_v27 = vadd.f32 %v410_v23, %v338_v19  ;;  %v418_v38 = vadd.f32 %v410_v23, %v342_v31 }
 0x22f   :  { %v419_v39 = vadd.f32 %v410_v23, %v346_v30  ;;  %v420_v59 = vadd.f32 %v410_v23, %v350_v48  ;;  %v421_v1 = vadd.f32 %v410_v23, %v354_v55  ;;  %v422_v10 = vadd.f32 %v410_v23, %v358_v4  ;;  %v2324_v23 = vld [vmem:[%s3480_s3 + $0x3] ss:$0 sm:$0xff] }
 0x230   :  { %v431_v34 = vmax.f32 %v415_v25, 0.0  ;;  %v432_v35 = vmax.f32 %v416_v26, 0.0  ;;  %v433_v40 = vmax.f32 %v417_v27, 0.0  ;;  %v434_v57 = vmax.f32 %v418_v38, 0.0 }
 0x231   :  { %v412_v37 = vpop.permute.xlu0 %411  ;;  %v435_v62 = vmax.f32 %v419_v39, 0.0  ;;  %v436_v7 = vmax.f32 %v420_v59, 0.0  ;;  %v437_v12 = vmax.f32 %v421_v1, 0.0  ;;  %v438_v16 = vmax.f32 %v422_v10, 0.0 }
 0x232   :  { %2507 = vmatprep.mubr.msk.f32.mxu0 %vm56_vm0, %v431_v34  ;;  %v423_v41 = vadd.f32 %v412_v37, %v362_v22  ;;  %v424_v42 = vadd.f32 %v412_v37, %v366_v28  ;;  %v425_v43 = vadd.f32 %v412_v37, %v370_v32  ;;  %v426_v60 = vadd.f32 %v412_v37, %v374_v49 }
 0x233   :  { %2508 = vmatmul.mubr.msk.f32.vlgmr.msra.gmra.mrb[4].mxu0 %vm56_vm0, %v432_v35  ;;  %v427_v2 = vadd.f32 %v412_v37, %v378_v50  ;;  %v428_v11 = vadd.f32 %v412_v37, %v382_v5  ;;  %v429_v14 = vadd.f32 %v412_v37, %v386_v6  ;;  %v430_v18 = vadd.f32 %v412_v37, %v390_v15 }
 0x234   :  { %2510 = vmatprep.mubr.msk.f32.mxu0 %vm56_vm0, %v433_v40  ;;  %v439_v52 = vmax.f32 %v423_v41, 0.0  ;;  %v440_v53 = vmax.f32 %v424_v42, 0.0  ;;  %v441_v0 = vmax.f32 %v425_v43, 0.0  ;;  %v442_v8 = vmax.f32 %v426_v60, 0.0 }
 0x235   :  { %v443_v13 = vmax.f32 %v427_v2, 0.0  ;;  %v444_v17 = vmax.f32 %v428_v11, 0.0  ;;  %v445_v19 = vmax.f32 %v429_v14, 0.0  ;;  %v2635_v22 = vpack.c.bf16 %v44_v21, %v43_v20 }
 0x236   :  { %2519 = vmatprep.mubr.msk.f32.mxu1 %vm56_vm0, %v439_v52  ;;  %v600_v24 = vadd.f32 %v2324_v23, %v2826_v63 }
 0x237   :  { %2511 = vmatmul.mubr.msk.f32.gmra.mrb[6].mxu0 %vm56_vm0, %v434_v57  ;;  %2520 = vmatmul.mubr.msk.f32.vlgmr.msra.gmra.mrb[4].mxu1 %vm56_vm0, %v440_v53 }
 0x238   :  { %2513 = vmatprep.mubr.msk.f32.mxu0 %vm56_vm0, %v435_v62  ;;  %2522 = vmatprep.mubr.msk.f32.mxu1 %vm56_vm0, %v441_v0  ;;  %v803_v25 = vrot.slane %v600_v24, %v2822_v58 }
 0x239   :  { %2630 = vmatpush3.bf16.msra.mxu1 %v2812_v51  ;;  %v446_v51 = vmax.f32 %v430_v18, 0.0  ;;  %2636 = vmatprep.subr.bf16.mxu0 %v2635_v22 }
 0x23a   :  { %2632 = vmatprep.subr.bf16.mxu1 %v2631_v61  ;;  %2638 = vmatpush3.bf16.msra.mxu0 %v2635_v22  ;;  %v804_v26 = vcombine.high %v803_v25, %v803_v25  ;;  %v811_v27 = vrot.slane %v803_v25, %v2822_v58 }
 0x23b   :  { %2514 = vmatmul.mubr.msk.f32.gmra.mrb[8].mxu0 %vm56_vm0, %v436_v7  ;;  %2523 = vmatmul.mubr.msk.f32.gmra.mrb[6].mxu1 %vm56_vm0, %v442_v8 }
 0x23c   :  { %2516 = vmatprep.mubr.msk.f32.mxu0 %vm56_vm0, %v437_v12  ;;  %2525 = vmatprep.mubr.msk.f32.mxu1 %vm56_vm0, %v443_v13  ;;  %v818_v28 = vrot.slane %v804_v26, %v2822_v58  ;;  %v822_v29 = vrot.slane %v811_v27, %v2833_v9 }
 0x23d   :  { %2634 = vmatpush3.bf16.msra.mxu1 %v2631_v61 }
 0x23e   :  { %v2895_v31 = vrot.slane %v818_v28, %v2833_v9 }
 0x23f   :  { %2517 = vmatmul.mubr.msk.f32.gmra.mrb[10].mxu0 %vm56_vm0, %v438_v16  ;;  %2526 = vmatmul.mubr.msk.f32.gmra.mrb[8].mxu1 %vm56_vm0, %v444_v17 }
 0x240   :  { %2528 = vmatprep.mubr.msk.f32.mxu1 %vm56_vm0, %v445_v19  ;;  %v2692_v19 = vmov 0  }
 0x241   :  { %2649 = vset.pattern.permute.xlu1 %v2692_v19  ;;  %2650 = vset.pattern.permute.xlu0 %v2692_v19 }
 0x243   :  { %2529 = vmatmul.mubr.msk.f32.gmra.mrb[10].mxu1 %vm56_vm0, %v446_v51  ;;  %v2342_v51 = vld [vmem:[%s3480_s3 + $0x4] ss:$0 sm:$0xff] }
 0x306   :  { %v2509_v30 = vpop.f32.mrb[4].mxu0 }
 0x307   :  { %v830_v32 = vadd.f32 %v2509_v30, %v822_v29  ;;  %v717_v33 = vpop.f32.mrb[5].mxu0 }
 0x308   :  { %v829_v34 = vadd.f32 %v822_v29, %v717_v33 }
 0x309   :  { %v846_v35 = vmax.f32 %v830_v32, 0.0 }
 0x30a   :  { %v845_v36 = vmax.f32 %v829_v34, 0.0  ;;  %v2512_v37 = vpop.f32.mrb[6].mxu0  ;;  %v2521_v63 = vpop.f32.mrb[4].mxu1 }
 0x30b   :  { %862 = vst.msk [vmem:[%s3481_s4 + $0x8] sm:$0xff] %vm56_vm0, %v846_v35  ;;  %v832_v38 = vadd.f32 %v2512_v37, %v822_v29  ;;  %v2902_v58 = vadd.f32 %v2521_v63, %v2895_v31  ;;  %v727_v39 = vpop.f32.mrb[7].mxu0  ;;  %v757_v40 = vpop.f32.mrb[5].mxu1 }
 0x30c   :  { %861 = vst.msk [vmem:[%s3481_s4] sm:$0xff] %vm56_vm0, %v845_v36  ;;  %v831_v41 = vadd.f32 %v822_v29, %v727_v39  ;;  %v837_v42 = vadd.f32 %v2895_v31, %v757_v40  ;;  %2539 = vmatprep.mubr.msk.f32.mxu1 %vm56_vm0, %v845_v36 }
 0x30d   :  { %v848_v43 = vmax.f32 %v832_v38, 0.0  ;;  %v854_v44 = vmax.f32 %v2902_v58, 0.0  ;;  %2540 = vmatmul.mubr.msk.f32.vlgmr.msra.gmra.mrb[12].mxu1 %vm56_vm0, %v846_v35 }
 0x30e   :  { %v847_v45 = vmax.f32 %v831_v41, 0.0  ;;  %v853_v46 = vmax.f32 %v837_v42, 0.0  ;;  %v2515_v47 = vpop.f32.mrb[8].mxu0  ;;  %v2524_v48 = vpop.f32.mrb[6].mxu1 }
 0x30f   :  { %864 = vst.msk [vmem:[%s3481_s4 + $0x18] sm:$0xff] %vm56_vm0, %v848_v43  ;;  %870 = vst.msk [vmem:[%s3481_s4 + $0x48] sm:$0xff] %vm56_vm0, %v854_v44  ;;  %v834_v49 = vadd.f32 %v2515_v47, %v822_v29  ;;  %v840_v50 = vadd.f32 %v2524_v48, %v2895_v31  ;;  %v737_v52 = vpop.f32.mrb[9].mxu0  ;;  %v767_v53 = vpop.f32.mrb[7].mxu1 }
 0x310   :  { %863 = vst.msk [vmem:[%s3481_s4 + $0x10] sm:$0xff] %vm56_vm0, %v847_v45  ;;  %869 = vst.msk [vmem:[%s3481_s4 + $0x40] sm:$0xff] %vm56_vm0, %v853_v46  ;;  %v833_v55 = vadd.f32 %v822_v29, %v737_v52  ;;  %v839_v57 = vadd.f32 %v2895_v31, %v767_v53  ;;  %2542 = vmatprep.mubr.msk.f32.mxu1 %vm56_vm0, %v847_v45 }
 0x311   :  { %v850_v59 = vmax.f32 %v834_v49, 0.0  ;;  %v856_v60 = vmax.f32 %v840_v50, 0.0  ;;  %2543 = vmatmul.mubr.msk.f32.gmra.mrb[14].mxu1 %vm56_vm0, %v848_v43 }
 0x312   :  { %v849_v61 = vmax.f32 %v833_v55, 0.0  ;;  %v855_v62 = vmax.f32 %v839_v57, 0.0  ;;  %v2518_v0 = vpop.f32.mrb[10].mxu0  ;;  %v2527_v1 = vpop.f32.mrb[8].mxu1 }
 0x313   :  { %866 = vst.msk [vmem:[%s3481_s4 + $0x28] sm:$0xff] %vm56_vm0, %v850_v59  ;;  %872 = vst.msk [vmem:[%s3481_s4 + $0x58] sm:$0xff] %vm56_vm0, %v856_v60  ;;  %v836_v2 = vadd.f32 %v2518_v0, %v822_v29  ;;  %v842_v3 = vadd.f32 %v2527_v1, %v2895_v31  ;;  %v747_v4 = vpop.f32.mrb[11].mxu0  ;;  %v777_v5 = vpop.f32.mrb[9].mxu1 }
 0x314   :  { %865 = vst.msk [vmem:[%s3481_s4 + $0x20] sm:$0xff] %vm56_vm0, %v849_v61  ;;  %871 = vst.msk [vmem:[%s3481_s4 + $0x50] sm:$0xff] %vm56_vm0, %v855_v62  ;;  %v835_v6 = vadd.f32 %v822_v29, %v747_v4  ;;  %v841_v7 = vadd.f32 %v2895_v31, %v777_v5  ;;  %2545 = vmatprep.mubr.msk.f32.mxu1 %vm56_vm0, %v849_v61 }
 0x315   :  { %v852_v8 = vmax.f32 %v836_v2, 0.0  ;;  %v858_v10 = vmax.f32 %v842_v3, 0.0  ;;  %2546 = vmatmul.mubr.msk.f32.gmra.mrb[16].mxu1 %vm56_vm0, %v850_v59 }
 0x316   :  { %v851_v11 = vmax.f32 %v835_v6, 0.0  ;;  %v857_v12 = vmax.f32 %v841_v7, 0.0  ;;  %v2530_v13 = vpop.f32.mrb[10].mxu1 }
 0x317   :  { %868 = vst.msk [vmem:[%s3481_s4 + $0x38] sm:$0xff] %vm56_vm0, %v852_v8  ;;  %874 = vst.msk [vmem:[%s3481_s4 + $0x68] sm:$0xff] %vm56_vm0, %v858_v10  ;;  %v844_v14 = vadd.f32 %v2530_v13, %v2895_v31  ;;  %v787_v15 = vpop.f32.mrb[11].mxu1 }
 0x318   :  { %867 = vst.msk [vmem:[%s3481_s4 + $0x30] sm:$0xff] %vm56_vm0, %v851_v11  ;;  %873 = vst.msk [vmem:[%s3481_s4 + $0x60] sm:$0xff] %vm56_vm0, %v857_v12  ;;  %v843_v16 = vadd.f32 %v2895_v31, %v787_v15  ;;  %2548 = vmatprep.mubr.msk.f32.mxu1 %vm56_vm0, %v851_v11 }
 0x319   :  { %v860_v17 = vmax.f32 %v844_v14, 0.0  ;;  %2549 = vmatmul.mubr.msk.f32.gmra.mrb[18].mxu1 %vm56_vm0, %v852_v8 }
 0x31a   :  { %v859_v18 = vmax.f32 %v843_v16, 0.0  ;;  %2551 = vmatprep.mubr.msk.f32.mxu1 %vm56_vm0, %v853_v46 }
 0x31b   :  { %876 = vst.msk [vmem:[%s3481_s4 + $0x78] sm:$0xff] %vm56_vm0, %v860_v17 }
 0x31c   :  { %875 = vst.msk [vmem:[%s3481_s4 + $0x70] sm:$0xff] %vm56_vm0, %v859_v18 }
 0x31d   :  { %2552 = vmatmul.mubr.msk.f32.gmra.mrb[20].mxu1 %vm56_vm0, %v854_v44 }
 0x31e   :  { %2554 = vmatprep.mubr.msk.f32.mxu1 %vm56_vm0, %v855_v62 }
 0x321   :  { %2555 = vmatmul.mubr.msk.f32.gmra.mrb[22].mxu1 %vm56_vm0, %v856_v60 }
 0x322   :  { %2557 = vmatprep.mubr.msk.f32.mxu1 %vm56_vm0, %v857_v12 }
 0x325   :  { %2558 = vmatmul.mubr.msk.f32.gmra.mrb[24].mxu1 %vm56_vm0, %v858_v10 }
 0x326   :  { %2560 = vmatprep.mubr.msk.f32.mxu1 %vm56_vm0, %v859_v18 }
 0x329   :  { %2561 = vmatmul.mubr.msk.f32.gmra.mrb[26].mxu1 %vm56_vm0, %v860_v17 }
 0x3e0   :  { %v2541_v20 = vpop.f32.mrb[12].mxu1 }
 0x3e1   :  { %v1001_v21 = vadd.f32 %v2541_v20, %v2342_v51  ;;  %v995_v22 = vpop.f32.mrb[13].mxu1 }
 0x3e2   :  { %v996_v23 = vadd.f32 %v2342_v51, %v995_v22 }
 0x3e3   :  { %v1075_v26 = vmax.f32 %v1001_v21, 0.0 }
 0x3e4   :  { %v1074_v24 = vmax.f32 %v996_v23, 0.0  ;;  %v2544_v25 = vpop.f32.mrb[14].mxu1 }
 0x3e5   :  { %v1011_v27 = vadd.f32 %v2544_v25, %v2342_v51  ;;  %v1005_v28 = vpop.f32.mrb[15].mxu1 }
 0x3e6   :  { %v1006_v29 = vadd.f32 %v2342_v51, %v1005_v28  ;;  %2567 = vmatprep.mubr.msk.f32.mxu0 %vm1090_vm2, %v1074_v24 }
 0x3e7   :  { %2568 = vmatmul.mubr.msk.f32.vlgmr.msra.gmra.mrb[12].mxu0 %vm1090_vm2, %v1075_v26  ;;  %v1077_v32 = vmax.f32 %v1011_v27, 0.0  ;;  %v3056_v27 = vand.u32 127, %v233_v54 }
 0x3e8   :  { %v1076_v30 = vmax.f32 %v1006_v29, 0.0  ;;  %v2547_v31 = vpop.f32.mrb[16].mxu1 }
 0x3e9   :  { %v1021_v33 = vadd.f32 %v2547_v31, %v2342_v51  ;;  %v1015_v34 = vpop.f32.mrb[17].mxu1 }
 0x3ea   :  { %v1016_v35 = vadd.f32 %v2342_v51, %v1015_v34  ;;  %2570 = vmatprep.mubr.msk.f32.mxu0 %vm1090_vm2, %v1076_v30  ;;  %v3060_v30 = vsub.s32 %v3056_v27, %v2816_v56 }
 0x3eb   :  { %2571 = vmatmul.mubr.msk.f32.gmra.mrb[14].mxu0 %vm1090_vm2, %v1077_v32  ;;  %v1079_v63 = vmax.f32 %v1021_v33, 0.0 }
 0x3ec   :  { %v1078_v36 = vmax.f32 %v1016_v35, 0.0  ;;  %v2550_v37 = vpop.f32.mrb[18].mxu1 }
 0x3ed   :  { %v1031_v38 = vadd.f32 %v2550_v37, %v2342_v51  ;;  %v1025_v58 = vpop.f32.mrb[19].mxu1 }
 0x3ee   :  { %v1026_v39 = vadd.f32 %v2342_v51, %v1025_v58  ;;  %2573 = vmatprep.mubr.msk.f32.mxu0 %vm1090_vm2, %v1078_v36 }
 0x3ef   :  { %2574 = vmatmul.mubr.msk.f32.gmra.mrb[16].mxu0 %vm1090_vm2, %v1079_v63  ;;  %v1081_v42 = vmax.f32 %v1031_v38, 0.0 }
 0x3f0   :  { %v1080_v40 = vmax.f32 %v1026_v39, 0.0  ;;  %v2553_v41 = vpop.f32.mrb[20].mxu1 }
 0x3f1   :  { %v1041_v43 = vadd.f32 %v2553_v41, %v2342_v51  ;;  %v1035_v44 = vpop.f32.mrb[21].mxu1 }
 0x3f2   :  { %v1036_v45 = vadd.f32 %v2342_v51, %v1035_v44  ;;  %2576 = vmatprep.mubr.msk.f32.mxu0 %vm1090_vm2, %v1080_v40 }
 0x3f3   :  { %2577 = vmatmul.mubr.msk.f32.gmra.mrb[18].mxu0 %vm1090_vm2, %v1081_v42  ;;  %v1083_v48 = vmax.f32 %v1041_v43, 0.0 }
 0x3f4   :  { %v1082_v46 = vmax.f32 %v1036_v45, 0.0  ;;  %v2556_v47 = vpop.f32.mrb[22].mxu1 }
 0x3f5   :  { %v1051_v49 = vadd.f32 %v2556_v47, %v2342_v51  ;;  %v1045_v50 = vpop.f32.mrb[23].mxu1 }
 0x3f6   :  { %v1046_v52 = vadd.f32 %v2342_v51, %v1045_v50  ;;  %2579 = vmatprep.mubr.msk.f32.mxu0 %vm1090_vm2, %v1082_v46 }
 0x3f7   :  { %2580 = vmatmul.mubr.msk.f32.gmra.mrb[20].mxu0 %vm1090_vm2, %v1083_v48  ;;  %v1085_v57 = vmax.f32 %v1051_v49, 0.0 }
 0x3f8   :  { %v1084_v53 = vmax.f32 %v1046_v52, 0.0  ;;  %v2559_v55 = vpop.f32.mrb[24].mxu1 }
 0x3f9   :  { %v1061_v59 = vadd.f32 %v2559_v55, %v2342_v51  ;;  %v1055_v60 = vpop.f32.mrb[25].mxu1 }
 0x3fa   :  { %v1056_v61 = vadd.f32 %v2342_v51, %v1055_v60  ;;  %2582 = vmatprep.mubr.msk.f32.mxu0 %vm1090_vm2, %v1084_v53 }
 0x3fb   :  { %2583 = vmatmul.mubr.msk.f32.gmra.mrb[22].mxu0 %vm1090_vm2, %v1085_v57  ;;  %v1087_v1 = vmax.f32 %v1061_v59, 0.0 }
 0x3fc   :  { %v1086_v62 = vmax.f32 %v1056_v61, 0.0  ;;  %v2562_v0 = vpop.f32.mrb[26].mxu1 }
 0x3fd   :  { %v1071_v2 = vadd.f32 %v2562_v0, %v2342_v51  ;;  %v1065_v3 = vpop.f32.mrb[27].mxu1 }
 0x3fe   :  { %v1066_v4 = vadd.f32 %v2342_v51, %v1065_v3  ;;  %2585 = vmatprep.mubr.msk.f32.mxu0 %vm1090_vm2, %v1086_v62 }
 0x3ff   :  { %2586 = vmatmul.mubr.msk.f32.gmra.mrb[24].mxu0 %vm1090_vm2, %v1087_v1  ;;  %v1089_v6 = vmax.f32 %v1071_v2, 0.0 }
 0x400   :  { %v1088_v5 = vmax.f32 %v1066_v4, 0.0 }
 0x402   :  { %2588 = vmatprep.mubr.msk.f32.mxu0 %vm1090_vm2, %v1088_v5 }
 0x403   :  { %2589 = vmatmul.mubr.msk.f32.gmra.mrb[26].mxu0 %vm1090_vm2, %v1089_v6 }
 0x4ba   :  { %v3007_v7 = vpop.f32.mrb[12].mxu0 }
 0x4bb   :  { %1304 = vperm.xlu1 %2649, %v3007_v7   ;;  %v3010_v8 = vpop.f32.mrb[13].mxu0 }
 0x4be   :  { %v3012_v10 = vpop.f32.mrb[14].mxu0 }
 0x4bf   :  { %1301 = vperm.xlu1 %2649, %v3010_v8   ;;  %v3015_v11 = vpop.f32.mrb[15].mxu0 }
 0x4c2   :  { %v3017_v12 = vpop.f32.mrb[16].mxu0 }
 0x4c3   :  { %1310 = vperm.xlu1 %2649, %v3012_v10   ;;  %v3020_v13 = vpop.f32.mrb[17].mxu0 }
 0x4c6   :  { %v3022_v14 = vpop.f32.mrb[18].mxu0 }
 0x4c7   :  { %1307 = vperm.xlu1 %2649, %v3015_v11   ;;  %v3025_v15 = vpop.f32.mrb[19].mxu0 }
 0x4ca   :  { %v3027_v16 = vpop.f32.mrb[20].mxu0 }
 0x4cb   :  { %1316 = vperm.xlu1 %2649, %v3017_v12   ;;  %v3030_v17 = vpop.f32.mrb[21].mxu0 }
 0x4cc   :  { %1325 = vperm.xlu0 %2650, %v3030_v17  }
 0x4ce   :  { %v3033_v18 = vpop.f32.mrb[22].mxu0 }
 0x4cf   :  { %1313 = vperm.xlu1 %2649, %v3020_v13   ;;  %v3036_v19 = vpop.f32.mrb[23].mxu0 }
 0x4d0   :  { %1334 = vperm.xlu0 %2650, %v3033_v18  }
 0x4d2   :  { %v3039_v51 = vpop.f32.mrb[24].mxu0 }
 0x4d3   :  { %1328 = vperm.xlu1 %2649, %v3027_v16   ;;  %v3042_v20 = vpop.f32.mrb[25].mxu0 }
 0x4d4   :  { %1331 = vperm.xlu0 %2650, %v3036_v19  }
 0x4d6   :  { %v3045_v21 = vpop.f32.mrb[26].mxu0 }
 0x4d7   :  { %1319 = vperm.xlu1 %2649, %v3025_v15   ;;  %v3048_v22 = vpop.f32.mrb[27].mxu0 }
 0x4d8   :  { %1340 = vperm.xlu0 %2650, %v3039_v51  }
 0x4db   :  { %1322 = vperm.xlu1 %2649, %v3022_v14  }
 0x4dc   :  { %1337 = vperm.xlu0 %2650, %v3042_v20  }
 0x4e0   :  { %1343 = vperm.xlu0 %2650, %v3048_v22  }
 0x4e4   :  { %1346 = vperm.xlu0 %2650, %v3045_v21  }
 0x53a   :  { %v1305_v23 = vpop.permute.xlu1 %1304 }
 0x53b   :  { %v1357_v35 = vrot.slane %v1305_v23, %v3060_v30 }
 0x53e   :  { %v1302_v24 = vpop.permute.xlu1 %1301 }
 0x53f   :  { %v1353_v32 = vrot.slane %v1302_v24, %v3060_v30 }
 0x541   :  { %v1415_v54 = vsel %vm1414_vm3, %v1357_v35, %v1353_v32 }
 0x542   :  { %v1311_v25 = vpop.permute.xlu1 %1310 }
 0x543   :  { %v1365_v58 = vrot.slane %v1311_v25, %v3060_v30 }
 0x546   :  { %v1308_v26 = vpop.permute.xlu1 %1307 }
 0x547   :  { %v1361_v34 = vrot.slane %v1308_v26, %v3060_v30 }
 0x549   :  { %v1417_v63 = vsel %vm1416_vm4, %v1361_v34, %v1415_v54 }
 0x54a   :  { %v1317_v28 = vpop.permute.xlu1 %1316  ;;  %v1419_v41 = vsel %vm1418_vm5, %v1365_v58, %v1417_v63 }
 0x54b   :  { %v1326_v29 = vpop.permute.xlu0 %1325  ;;  %v1373_v46 = vrot.slane %v1317_v28, %v3060_v30  ;;  %v3095_v28 = vsub.s32 1, %v2816_v56 }
 0x54c   :  { %v1385_v43 = vrot.slane %v1326_v29, %v3060_v30  ;;  %v3098_v29 = vsub.s32 2, %v2816_v56 }
 0x54e   :  { %v1314_v31 = vpop.permute.xlu1 %1313 }
 0x54f   :  { %v1335_v33 = vpop.permute.xlu0 %1334  ;;  %v1369_v38 = vrot.slane %v1314_v31, %v3060_v30  ;;  %v3101_v31 = vsub.s32 3, %v2816_v56 }
 0x550   :  { %v1397_v61 = vrot.slane %v1335_v33, %v3060_v30 }
 0x551   :  { %v1421_v44 = vsel %vm1420_vm6, %v1369_v38, %v1419_v41 }
 0x552   :  { %v1329_v36 = vpop.permute.xlu1 %1328  ;;  %v1423_v53 = vsel %vm1422_vm7, %v1373_v46, %v1421_v44 }
 0x553   :  { %v1332_v37 = vpop.permute.xlu0 %1331  ;;  %v1389_v39 = vrot.slane %v1329_v36, %v3060_v30 }
 0x554   :  { %v1393_v47 = vrot.slane %v1332_v37, %v3060_v30  ;;  %v3114_v37 = vsub.s32 4, %v2816_v56 }
 0x555   :  { %v1428_v48 = vsel %vm1414_vm3, %v1389_v39, %v1385_v43 }
 0x556   :  { %v1320_v40 = vpop.permute.xlu1 %1319  ;;  %v1429_v57 = vsel %vm1416_vm4, %v1393_v47, %v1428_v48 }
 0x557   :  { %v1341_v42 = vpop.permute.xlu0 %1340  ;;  %v1377_v45 = vrot.slane %v1320_v40, %v3060_v30  ;;  %v1430_v1 = vsel %vm1418_vm5, %v1397_v61, %v1429_v57  ;;  %v3120_v40 = vsub.s32 5, %v2816_v56 }
 0x558   :  { %v1405_v4 = vrot.slane %v1341_v42, %v3060_v30 }
 0x559   :  { %v1425_v55 = vsel %vm1424_vm8, %v1377_v45, %v1423_v53 }
 0x55a   :  { %v1323_v49 = vpop.permute.xlu1 %1322 }
 0x55b   :  { %v1381_v50 = vrot.slane %v1323_v49, %v3060_v30  ;;  %v1338_v52 = vpop.permute.xlu0 %1337  ;;  %v3134_v49 = vsub.s32 6, %v2816_v56 }
 0x55c   :  { %v1401_v59 = vrot.slane %v1338_v52, %v3060_v30 }
 0x55d   :  { %v1427_v60 = vsel %vm1426_vm9, %v1381_v50, %v1425_v55 }
 0x55e   :  { %v1438_v62 = vsel %vm1437_vm10, %v1427_v60, -inf  ;;  %v1431_v2 = vsel %vm1420_vm6, %v1401_v59, %v1430_v1  ;;  %v3146_v60 = vsub.s32 7, %v2816_v56 }
 0x55f   :  { %1439 = vmax.xlane.f32.xlu1 %v1438_v62  ;;  %v1344_v0 = vpop.permute.xlu0 %1343  ;;  %v1432_v23 = vsel %vm1422_vm7, %v1405_v4, %v1431_v2 }
 0x560   :  { %v1409_v3 = vrot.slane %v1344_v0, %v3060_v30 }
 0x562   :  { %v1433_v24 = vsel %vm1424_vm8, %v1409_v3, %v1432_v23 }
 0x563   :  { %v1347_v5 = vpop.permute.xlu0 %1346 }
 0x564   :  { %v1413_v6 = vrot.slane %v1347_v5, %v3060_v30 }
 0x566   :  { %v1434_v25 = vsel %vm1426_vm9, %v1413_v6, %v1433_v24 }
 0x567   :  { %v1441_v26 = vsel %vm1437_vm10, %v1434_v25, -inf }
 0x568   :  { %1442 = vmax.xlane.f32.xlu0 %v1441_v26 }
 0x5ec   :  { %v3103_v32 = vpop.xlane.xlu1 %1439 }
 0x5ed   :  { %v1449_v33 = vrot.slane %v3103_v32, %v2833_v9  ;;  %v1453_v34 = vrot.slane %v3103_v32, %v3095_v28  ;;  %v1457_v35 = vrot.slane %v3103_v32, %v3098_v29  ;;  %v1461_v63 = vrot.slane %v3103_v32, %v3101_v31 }
 0x5ee   :  { %v1465_v41 = vrot.slane %v3103_v32, %v3114_v37  ;;  %v1477_v56 = vrot.slane %v3103_v32, %v3146_v60 }
 0x5ef   :  { %v1526_v36 = vsub.f32 %v3010_v8, %v1449_v33  ;;  %v1527_v54 = vsub.f32 %v3007_v7, %v1453_v34  ;;  %v1528_v38 = vsub.f32 %v3015_v11, %v1457_v35  ;;  %v1529_v8 = vsub.f32 %v3012_v10, %v1461_v63 }
 0x5f0   :  { %v1469_v11 = vrot.slane %v3103_v32, %v3120_v40  ;;  %v1530_v45 = vsub.f32 %v3020_v13, %v1465_v41  ;;  %v1533_v24 = vsub.f32 %v3022_v14, %v1477_v56 }
 0x5f1   :  { %v1542_v58 = vmul.f32 1.442695, %v1526_v36  ;;  %v1544_v39 = vmul.f32 1.442695, %v1527_v54  ;;  %v1546_v7 = vmul.f32 1.442695, %v1528_v38 }
 0x5f2   :  { %v1548_v46 = vmul.f32 1.442695, %v1529_v8  ;;  %v1531_v52 = vsub.f32 %v3017_v12, %v1469_v11  ;;  %v1550_v53 = vmul.f32 1.442695, %v1530_v45  ;;  %v1473_v12 = vrot.slane %v3103_v32, %v3134_v49 }
 0x5f3   :  { %2651 = vpow2.f32 %v1542_v58  ;;  %v1556_v34 = vmul.f32 1.442695, %v1533_v24 }
 0x5f4   :  { %2653 = vpow2.f32 %v1544_v39  ;;  %v1552_v61 = vmul.f32 1.442695, %v1531_v52  ;;  %v1532_v3 = vsub.f32 %v3025_v15, %v1473_v12 }
 0x5f5   :  { %v1443_v42 = vpop.xlane.xlu0 %1442  ;;  %2655 = vpow2.f32 %v1546_v7 }
 0x5f6   :  { %v1485_v43 = vrot.slane %v1443_v42, %v3095_v28  ;;  %v1489_v44 = vrot.slane %v1443_v42, %v3098_v29  ;;  %v1493_v48 = vrot.slane %v1443_v42, %v3101_v31  ;;  %2657 = vpow2.f32 %v1548_v46 }
 0x5f7   :  { %v1481_v55 = vrot.slane %v1443_v42, %v2833_v9  ;;  %v1554_v25 = vmul.f32 1.442695, %v1532_v3  ;;  %v1509_v26 = vrot.slane %v1443_v42, %v3146_v60 }
 0x5f8   :  { %v1535_v47 = vsub.f32 %v3027_v16, %v1485_v43  ;;  %v1536_v10 = vsub.f32 %v3036_v19, %v1489_v44  ;;  %v1497_v16 = vrot.slane %v1443_v42, %v3114_v37  ;;  %v1537_v59 = vsub.f32 %v3033_v18, %v1493_v48 }
 0x5f9   :  { %v1534_v62 = vsub.f32 %v3030_v17, %v1481_v55  ;;  %v1501_v18 = vrot.slane %v1443_v42, %v3120_v40  ;;  %v1505_v17 = vrot.slane %v1443_v42, %v3134_v49  ;;  %v1541_v35 = vsub.f32 %v3045_v21, %v1509_v26 }
 0x5fa   :  { %v1560_v50 = vmul.f32 1.442695, %v1535_v47  ;;  %v1562_v19 = vmul.f32 1.442695, %v1536_v10  ;;  %v1538_v1 = vsub.f32 %v3042_v20, %v1497_v16  ;;  %v1564_v2 = vmul.f32 1.442695, %v1537_v59 }
 0x5fb   :  { %v1558_v4 = vmul.f32 1.442695, %v1534_v62  ;;  %v1539_v6 = vsub.f32 %v3039_v51, %v1501_v18  ;;  %v1540_v32 = vsub.f32 %v3048_v22, %v1505_v17  ;;  %v1572_v63 = vmul.f32 1.442695, %v1541_v35 }
 0x5fc   :  { %2659 = vpow2.f32 %v1560_v50  ;;  %v1566_v23 = vmul.f32 1.442695, %v1538_v1 }
 0x5fd   :  { %v3138_v57 = vpop.eup %2651  ;;  %2661 = vpow2.f32 %v1550_v53  ;;  %v1568_v51 = vmul.f32 1.442695, %v1539_v6  ;;  %v1570_v36 = vmul.f32 1.442695, %v1540_v32 }
 0x5fe   :  { %v3140_v13 = vpop.eup %2653  ;;  %1591 = vperm.xlu0 %2650, %v3138_v57   ;;  %2663 = vpow2.f32 %v1562_v19 }
 0x5ff   :  { %1594 = vperm.xlu1 %2649, %v3140_v13   ;;  %v3152_v0 = vpop.eup %2655  ;;  %2665 = vpow2.f32 %v1552_v61 }
 0x600   :  { %v3160_v5 = vpop.eup %2657  ;;  %2667 = vpow2.f32 %v1564_v2 }
 0x601   :  { %2669 = vpow2.f32 %v1558_v4 }
 0x602   :  { %2671 = vpow2.f32 %v1566_v23 }
 0x603   :  { %1597 = vperm.xlu1 %2649, %v3152_v0   ;;  %2673 = vpow2.f32 %v1554_v25 }
 0x604   :  { %2675 = vpow2.f32 %v1568_v51 }
 0x605   :  { %2677 = vpow2.f32 %v1556_v34 }
 0x606   :  { %v3165_v20 = vpop.eup %2659  ;;  %2679 = vpow2.f32 %v1570_v36 }
 0x607   :  { %1600 = vperm.xlu1 %2649, %v3160_v5   ;;  %1618 = vperm.xlu0 %2650, %v3165_v20   ;;  %v3169_v15 = vpop.eup %2661  ;;  %2681 = vpow2.f32 %v1572_v63 }
 0x608   :  { %v3174_v33 = vpop.eup %2663 }
 0x609   :  { %v3177_v14 = vpop.eup %2665 }
 0x60a   :  { %v3181_v54 = vpop.eup %2667 }
 0x60b   :  { %1603 = vperm.xlu1 %2649, %v3169_v15   ;;  %1621 = vperm.xlu0 %2650, %v3174_v33   ;;  %v3184_v22 = vpop.eup %2669 }
 0x60c   :  { %v3187_v38 = vpop.eup %2671 }
 0x60d   :  { %v3190_v21 = vpop.eup %2673 }
 0x60e   :  { %v3193_v58 = vpop.eup %2675 }
 0x60f   :  { %1606 = vperm.xlu1 %2649, %v3177_v14   ;;  %1624 = vperm.xlu0 %2650, %v3181_v54   ;;  %v3196_v39 = vpop.eup %2677 }
 0x610   :  { %v3199_v41 = vpop.eup %2679 }
 0x611   :  { %v3202_v8 = vpop.eup %2681 }
 0x613   :  { %1615 = vperm.xlu1 %2649, %v3184_v22   ;;  %1627 = vperm.xlu0 %2650, %v3187_v38  }
 0x617   :  { %1609 = vperm.xlu1 %2649, %v3190_v21   ;;  %1630 = vperm.xlu0 %2650, %v3193_v58  }
 0x61b   :  { %1612 = vperm.xlu1 %2649, %v3196_v39   ;;  %1633 = vperm.xlu0 %2650, %v3199_v41  }
 0x61f   :  { %1636 = vperm.xlu0 %2650, %v3202_v8  }
 0x67d   :  { %v1592_v43 = vpop.permute.xlu0 %1591 }
 0x67e   :  { %v1595_v7 = vpop.permute.xlu1 %1594  ;;  %v1641_v52 = vrot.slane %v1592_v43, %v3060_v30 }
 0x67f   :  { %v1645_v50 = vrot.slane %v1595_v7, %v3060_v30 }
 0x681   :  { %v1702_v1 = vsel %vm1414_vm3, %v1645_v50, %v1641_v52 }
 0x682   :  { %v1598_v42 = vpop.permute.xlu1 %1597 }
 0x683   :  { %v1649_v16 = vrot.slane %v1598_v42, %v3060_v30 }
 0x685   :  { %v1703_v56 = vsel %vm1416_vm4, %v1649_v16, %v1702_v1 }
 0x686   :  { %v1601_v44 = vpop.permute.xlu1 %1600  ;;  %v1619_v11 = vpop.permute.xlu0 %1618 }
 0x687   :  { %v1677_v53 = vrot.slane %v1619_v11, %v3060_v30  ;;  %v1653_v19 = vrot.slane %v1601_v44, %v3060_v30 }
 0x689   :  { %v1704_v6 = vsel %vm1418_vm5, %v1653_v19, %v1703_v56 }
 0x68a   :  { %v1604_v45 = vpop.permute.xlu1 %1603  ;;  %v1622_v46 = vpop.permute.xlu0 %1621 }
 0x68b   :  { %v1657_v61 = vrot.slane %v1604_v45, %v3060_v30  ;;  %v1681_v62 = vrot.slane %v1622_v46, %v3060_v30 }
 0x68d   :  { %v1705_v24 = vsel %vm1420_vm6, %v1657_v61, %v1704_v6 }
 0x68e   :  { %v1607_v47 = vpop.permute.xlu1 %1606  ;;  %v1625_v48 = vpop.permute.xlu0 %1624 }
 0x68f   :  { %v1661_v2 = vrot.slane %v1607_v47, %v3060_v30  ;;  %v1685_v23 = vrot.slane %v1625_v48, %v3060_v30 }
 0x691   :  { %v1706_v26 = vsel %vm1422_vm7, %v1661_v2, %v1705_v24 }
 0x692   :  { %v1616_v10 = vpop.permute.xlu1 %1615  ;;  %v1628_v59 = vpop.permute.xlu0 %1627 }
 0x693   :  { %v1673_v55 = vrot.slane %v1616_v10, %v3060_v30  ;;  %v1689_v34 = vrot.slane %v1628_v59, %v3060_v30 }
 0x695   :  { %v1709_v12 = vsel %vm1414_vm3, %v1677_v53, %v1673_v55 }
 0x696   :  { %v1610_v18 = vpop.permute.xlu1 %1609  ;;  %v1710_v3 = vsel %vm1416_vm4, %v1681_v62, %v1709_v12  ;;  %v1631_v17 = vpop.permute.xlu0 %1630 }
 0x697   :  { %v1665_v4 = vrot.slane %v1610_v18, %v3060_v30  ;;  %v1711_v32 = vsel %vm1418_vm5, %v1685_v23, %v1710_v3  ;;  %v1693_v63 = vrot.slane %v1631_v17, %v3060_v30 }
 0x698   :  { %v1712_v42 = vsel %vm1420_vm6, %v1689_v34, %v1711_v32 }
 0x699   :  { %v1707_v36 = vsel %vm1424_vm8, %v1665_v4, %v1706_v26  ;;  %v1713_v45 = vsel %vm1422_vm7, %v1693_v63, %v1712_v42 }
 0x69a   :  { %v1613_v25 = vpop.permute.xlu1 %1612  ;;  %v1634_v35 = vpop.permute.xlu0 %1633 }
 0x69b   :  { %v1669_v51 = vrot.slane %v1613_v25, %v3060_v30  ;;  %v1697_v43 = vrot.slane %v1634_v35, %v3060_v30 }
 0x69d   :  { %v1708_v7 = vsel %vm1426_vm9, %v1669_v51, %v1707_v36  ;;  %v1714_v47 = vsel %vm1424_vm8, %v1697_v43, %v1713_v45 }
 0x69e   :  { %v1718_v44 = vsel %vm1437_vm10, %v1708_v7, 0.0  ;;  %v1637_v11 = vpop.permute.xlu0 %1636 }
 0x69f   :  { %1719 = vadd.xlane.f32.xlu1 %v1718_v44  ;;  %v1701_v46 = vrot.slane %v1637_v11, %v3060_v30 }
 0x6a1   :  { %v1715_v48 = vsel %vm1426_vm9, %v1701_v46, %v1714_v47 }
 0x6a2   :  { %v1721_v10 = vsel %vm1437_vm10, %v1715_v48, 0.0 }
 0x6a3   :  { %1722 = vadd.xlane.f32.xlu0 %v1721_v10 }
 0x72c   :  { %v1720_v50 = vpop.xlane.xlu1 %1719 }
 0x72d   :  { %2683 = vrcp.f32 %v1720_v50 }
 0x730   :  { %v1723_v52 = vpop.xlane.xlu0 %1722 }
 0x731   :  { %2685 = vrcp.f32 %v1723_v52 }
 0x737   :  { %v2684_v53 = vpop.eup %2683 }
 0x738   :  { %v1735_v55 = vrot.slane %v2684_v53, %v3095_v28  ;;  %v1731_v16 = vrot.slane %v2684_v53, %v2833_v9  ;;  %v1739_v12 = vrot.slane %v2684_v53, %v3098_v29  ;;  %v1743_v1 = vrot.slane %v2684_v53, %v3101_v31 }
 0x739   :  { %v1747_v56 = vrot.slane %v2684_v53, %v3114_v37  ;;  %v1751_v4 = vrot.slane %v2684_v53, %v3120_v40  ;;  %v1755_v24 = vrot.slane %v2684_v53, %v3134_v49  ;;  %v1759_v26 = vrot.slane %v2684_v53, %v3146_v60 }
 0x73a   :  { %v3240_v59 = vmul.f32 %v3140_v13, %v1735_v55  ;;  %v3243_v19 = vmul.f32 %v3138_v57, %v1731_v16  ;;  %v3249_v62 = vmul.f32 %v3152_v0, %v1739_v12  ;;  %v3260_v2 = vmul.f32 %v3160_v5, %v1743_v1 }
 0x73b   :  { %v2686_v61 = vpop.eup %2685 }
 0x73c   :  { %1845 = vperm.xlu1 %2649, %v3240_v59   ;;  %1842 = vperm.xlu0 %2650, %v3243_v19   ;;  %v1767_v18 = vrot.slane %v2686_v61, %v3095_v28  ;;  %v1771_v57 = vrot.slane %v2686_v61, %v3098_v29  ;;  %v1775_v3 = vrot.slane %v2686_v61, %v3101_v31 }
 0x73d   :  { %v1779_v17 = vrot.slane %v2686_v61, %v3114_v37  ;;  %v1763_v6 = vrot.slane %v2686_v61, %v2833_v9  ;;  %v1783_v23 = vrot.slane %v2686_v61, %v3120_v40  ;;  %v1787_v25 = vrot.slane %v2686_v61, %v3134_v49 }
 0x73e   :  { %v3255_v13 = vmul.f32 %v3165_v20, %v1767_v18  ;;  %v3265_v0 = vmul.f32 %v3174_v33, %v1771_v57  ;;  %v3270_v20 = vmul.f32 %v3169_v15, %v1747_v56  ;;  %v3275_v5 = vmul.f32 %v3181_v54, %v1775_v3 }
 0x73f   :  { %v3280_v33 = vmul.f32 %v3177_v14, %v1751_v4  ;;  %v3285_v15 = vmul.f32 %v3187_v38, %v1779_v17  ;;  %v3290_v54 = vmul.f32 %v3184_v22, %v1763_v6  ;;  %v3295_v14 = vmul.f32 %v3193_v58, %v1783_v23 }
 0x740   :  { %1848 = vperm.xlu1 %2649, %v3249_v62   ;;  %1869 = vperm.xlu0 %2650, %v3255_v13   ;;  %v3300_v38 = vmul.f32 %v3190_v21, %v1755_v24  ;;  %v3305_v22 = vmul.f32 %v3199_v41, %v1787_v25  ;;  %v1791_v32 = vrot.slane %v2686_v61, %v3146_v60 }
 0x741   :  { %v3310_v58 = vmul.f32 %v3196_v39, %v1759_v26 }
 0x742   :  { %v3314_v51 = vmul.f32 %v3202_v8, %v1791_v32 }
 0x744   :  { %1851 = vperm.xlu1 %2649, %v3260_v2   ;;  %1872 = vperm.xlu0 %2650, %v3265_v0  }
 0x748   :  { %1854 = vperm.xlu1 %2649, %v3270_v20   ;;  %1875 = vperm.xlu0 %2650, %v3275_v5  }
 0x74c   :  { %1857 = vperm.xlu1 %2649, %v3280_v33   ;;  %1878 = vperm.xlu0 %2650, %v3285_v15  }
 0x750   :  { %1866 = vperm.xlu1 %2649, %v3290_v54   ;;  %1881 = vperm.xlu0 %2650, %v3295_v14  }
 0x754   :  { %1860 = vperm.xlu1 %2649, %v3300_v38   ;;  %1884 = vperm.xlu0 %2650, %v3305_v22  }
 0x758   :  { %1863 = vperm.xlu1 %2649, %v3310_v58   ;;  %1887 = vperm.xlu0 %2650, %v3314_v51  }
 0x7bb   :  { %v1846_v21 = vpop.permute.xlu1 %1845  ;;  %v1843_v34 = vpop.permute.xlu0 %1842 }
 0x7bc   :  { %v1896_v39 = vrot.slane %v1846_v21, %v3060_v30  ;;  %v1892_v45 = vrot.slane %v1843_v34, %v3060_v30 }
 0x7be   :  { %v1953_v18 = vsel %vm1414_vm3, %v1896_v39, %v1892_v45 }
 0x7bf   :  { %v1849_v35 = vpop.permute.xlu1 %1848  ;;  %v1870_v36 = vpop.permute.xlu0 %1869 }
 0x7c0   :  { %v1928_v8 = vrot.slane %v1870_v36, %v3060_v30  ;;  %v1900_v47 = vrot.slane %v1849_v35, %v3060_v30 }
 0x7c2   :  { %v1954_v56 = vsel %vm1416_vm4, %v1900_v47, %v1953_v18 }
 0x7c3   :  { %v1852_v41 = vpop.permute.xlu1 %1851  ;;  %v1873_v63 = vpop.permute.xlu0 %1872 }
 0x7c4   :  { %v1932_v48 = vrot.slane %v1873_v63, %v3060_v30  ;;  %v1904_v50 = vrot.slane %v1852_v41, %v3060_v30 }
 0x7c6   :  { %v1955_v6 = vsel %vm1418_vm5, %v1904_v50, %v1954_v56 }
 0x7c7   :  { %v1855_v7 = vpop.permute.xlu1 %1854  ;;  %v1876_v42 = vpop.permute.xlu0 %1875 }
 0x7c8   :  { %v1936_v52 = vrot.slane %v1876_v42, %v3060_v30  ;;  %v1908_v55 = vrot.slane %v1855_v7, %v3060_v30 }
 0x7ca   :  { %v1956_v24 = vsel %vm1420_vm6, %v1908_v55, %v1955_v6 }
 0x7cb   :  { %v1858_v43 = vpop.permute.xlu1 %1857  ;;  %v1879_v44 = vpop.permute.xlu0 %1878 }
 0x7cc   :  { %v1940_v16 = vrot.slane %v1879_v44, %v3060_v30  ;;  %v1912_v1 = vrot.slane %v1858_v43, %v3060_v30 }
 0x7ce   :  { %v1957_v32 = vsel %vm1422_vm7, %v1912_v1, %v1956_v24 }
 0x7cf   :  { %v1867_v11 = vpop.permute.xlu1 %1866  ;;  %v1882_v10 = vpop.permute.xlu0 %1881 }
 0x7d0   :  { %v1924_v46 = vrot.slane %v1867_v11, %v3060_v30  ;;  %v1944_v23 = vrot.slane %v1882_v10, %v3060_v30  ;;  %v3356_v11 = vcvt.s32.f32 %v3056_v27 }
 0x7d2   :  { %v1960_v53 = vsel %vm1414_vm3, %v1928_v8, %v1924_v46 }
 0x7d3   :  { %v1961_v12 = vsel %vm1416_vm4, %v1932_v48, %v1960_v53  ;;  %v1861_v61 = vpop.permute.xlu1 %1860  ;;  %v1885_v17 = vpop.permute.xlu0 %1884 }
 0x7d4   :  { %v1962_v57 = vsel %vm1418_vm5, %v1936_v52, %v1961_v12  ;;  %v1916_v4 = vrot.slane %v1861_v61, %v3060_v30  ;;  %v1948_v25 = vrot.slane %v1885_v17, %v3060_v30 }
 0x7d5   :  { %v1963_v3 = vsel %vm1420_vm6, %v1940_v16, %v1962_v57 }
 0x7d6   :  { %v1964_v21 = vsel %vm1422_vm7, %v1944_v23, %v1963_v3  ;;  %v1958_v36 = vsel %vm1424_vm8, %v1916_v4, %v1957_v32 }
 0x7d7   :  { %v1864_v26 = vpop.permute.xlu1 %1863  ;;  %v1888_v35 = vpop.permute.xlu0 %1887  ;;  %v1965_v42 = vsel %vm1424_vm8, %v1948_v25, %v1964_v21 }
 0x7d8   :  { %v1920_v34 = vrot.slane %v1864_v26, %v3060_v30  ;;  %v1952_v41 = vrot.slane %v1888_v35, %v3060_v30 }
 0x7da   :  { %v3345_v63 = vsel %vm1426_vm9, %v1920_v34, %v1958_v36  ;;  %v3351_v43 = vsel %vm1426_vm9, %v1952_v41, %v1965_v42 }
 0x7db   :  { %v1969_v7 = vsel %vm1437_vm10, %v3345_v63, -inf  ;;  %v1972_v44 = vsel %vm1437_vm10, %v3351_v43, -inf }
 0x7dc   :  { %1970 = vmax.xlane.f32.xlu1 %v1969_v7  ;;  %1973 = vmax.xlane.f32.xlu0 %v1972_v44 }
 0x7f2   :  { %2075 = vbcast.lane.b32.xlu0 %v3356_v11, 256 }
 0x869   :  { %v3359_v39 = vpop.xlane.xlu1 %1970  ;;  %v3361_v45 = vpop.xlane.xlu0 %1973 }
 0x86a   :  { %v1988_v8 = vrot.slane %v3359_v39, %v3098_v29  ;;  %v1980_v46 = vrot.slane %v3359_v39, %v2833_v9  ;;  %v1992_v27 = vrot.slane %v3359_v39, %v3101_v31  ;;  %v1984_v48 = vrot.slane %v3359_v39, %v3095_v28 }
 0x86b   :  { %v2016_v52 = vrot.slane %v3361_v45, %v3095_v28  ;;  %v2020_v55 = vrot.slane %v3361_v45, %v3098_v29  ;;  %v2000_v28 = vrot.slane %v3359_v39, %v3120_v40 }
 0x86c   :  { %vm2059_vm11 = vcmp.eq.f32.partialorder %v3249_v62, %v1988_v8  ;;  %vm2057_vm12 = vcmp.eq.f32.partialorder %v3243_v19, %v1980_v46  ;;  %vm2060_vm13 = vcmp.eq.f32.partialorder %v3260_v2, %v1992_v27  ;;  %vm2058_vm14 = vcmp.eq.f32.partialorder %v3240_v59, %v1984_v48 }
 0x86d   :  { %v2076_v47 = vpop.permute.xlu0 %2075  ;;  %v1996_v19 = vrot.slane %v3359_v39, %v3114_v37  ;;  %vm2066_vm15 = vcmp.eq.f32.partialorder %v3255_v13, %v2016_v52  ;;  %vm2067_vm1 = vcmp.eq.f32.partialorder %v3265_v0, %v2020_v55  ;;  %v2012_v59 = vrot.slane %v3361_v45, %v2833_v9 }
 0x86e   :  { %v2080_v10 = vsel %vm2059_vm11, %v2076_v47, 8.0  ;;  %v2078_v50 = vsel %vm2057_vm12, %v2076_v47, 8.0  ;;  %v2081_v62 = vsel %vm2060_vm13, %v2076_v47, 8.0  ;;  %v2079_v53 = vsel %vm2058_vm14, %v2076_v47, 8.0 }
 0x86f   :  { %2117 = vperm.xlu0 %2650, %v2080_v10   ;;  %2111 = vperm.xlu1 %2649, %v2078_v50   ;;  %vm2061_vm0 = vcmp.eq.f32.partialorder %v3270_v20, %v1996_v19  ;;  %v2087_v16 = vsel %vm2066_vm15, %v2076_v47, 8.0  ;;  %v2024_v13 = vrot.slane %v3361_v45, %v3101_v31  ;;  %vm2062_vm2 = vcmp.eq.f32.partialorder %v3280_v33, %v2000_v28 }
 0x870   :  { %v2082_v2 = vsel %vm2061_vm0, %v2076_v47, 8.0  ;;  %v2083_v29 = vsel %vm2062_vm2, %v2076_v47, 8.0  ;;  %v2088_v12 = vsel %vm2067_vm1, %v2076_v47, 8.0  ;;  %vm2065_vm11 = vcmp.eq.f32.partialorder %v3290_v54, %v2012_v59 }
 0x871   :  { %vm2068_vm12 = vcmp.eq.f32.partialorder %v3275_v5, %v2024_v13  ;;  %v2028_v20 = vrot.slane %v3361_v45, %v3114_v37  ;;  %v2004_v0 = vrot.slane %v3359_v39, %v3134_v49  ;;  %v2086_v9 = vsel %vm2065_vm11, %v2076_v47, 8.0 }
 0x872   :  { %v2089_v61 = vsel %vm2068_vm12, %v2076_v47, 8.0  ;;  %v2032_v31 = vrot.slane %v3361_v45, %v3120_v40  ;;  %v2008_v5 = vrot.slane %v3359_v39, %v3146_v60  ;;  %v2036_v37 = vrot.slane %v3361_v45, %v3134_v49 }
 0x873   :  { %2120 = vperm.xlu0 %2650, %v2081_v62   ;;  %2114 = vperm.xlu1 %2649, %v2079_v53   ;;  %vm2069_vm13 = vcmp.eq.f32.partialorder %v3285_v15, %v2028_v20  ;;  %vm2063_vm14 = vcmp.eq.f32.partialorder %v3300_v38, %v2004_v0  ;;  %v2040_v40 = vrot.slane %v3361_v45, %v3146_v60 }
 0x874   :  { %v2084_v33 = vsel %vm2063_vm14, %v2076_v47, 8.0  ;;  %v2090_v54 = vsel %vm2069_vm13, %v2076_v47, 8.0  ;;  %vm2070_vm15 = vcmp.eq.f32.partialorder %v3295_v14, %v2032_v31  ;;  %vm2064_vm0 = vcmp.eq.f32.partialorder %v3310_v58, %v2008_v5 }
 0x875   :  { %v2085_v15 = vsel %vm2064_vm0, %v2076_v47, 8.0  ;;  %v2091_v18 = vsel %vm2070_vm15, %v2076_v47, 8.0  ;;  %vm2071_vm1 = vcmp.eq.f32.partialorder %v3305_v22, %v2036_v37  ;;  %vm2072_vm2 = vcmp.eq.f32.partialorder %v3314_v51, %v2040_v40 }
 0x876   :  { %v2092_v38 = vsel %vm2071_vm1, %v2076_v47, 8.0  ;;  %v2093_v1 = vsel %vm2072_vm2, %v2076_v47, 8.0  ;;  %vm2296_vm14 = vcmask 72704   ;;  %vm2299_vm15 = vcmask 80896  }
 0x877   :  { %2123 = vperm.xlu0 %2650, %v2082_v2   ;;  %2138 = vperm.xlu1 %2649, %v2087_v16   ;;  %vm2302_vm0 = vcmask 89088   ;;  %vm2305_vm1 = vcmask 97280  }
 0x87b   :  { %2126 = vperm.xlu0 %2650, %v2083_v29   ;;  %2141 = vperm.xlu1 %2649, %v2088_v12  }
 0x87f   :  { %2135 = vperm.xlu0 %2650, %v2086_v9   ;;  %2144 = vperm.xlu1 %2649, %v2089_v61  }
 0x883   :  { %2129 = vperm.xlu0 %2650, %v2084_v33   ;;  %2147 = vperm.xlu1 %2649, %v2090_v54  }
 0x887   :  { %2132 = vperm.xlu0 %2650, %v2085_v15   ;;  %2150 = vperm.xlu1 %2649, %v2091_v18  }
 0x88b   :  { %2153 = vperm.xlu1 %2649, %v2092_v38  }
 0x88f   :  { %2156 = vperm.xlu1 %2649, %v2093_v1  }
 0x8ee   :  { %v2118_v14 = vpop.permute.xlu0 %2117  ;;  %v2112_v57 = vpop.permute.xlu1 %2111 }
 0x8ef   :  { %v2161_v22 = vrot.slane %v2112_v57, %v3060_v30  ;;  %v2169_v23 = vrot.slane %v2118_v14, %v3060_v30 }
 0x8f2   :  { %v2121_v49 = vpop.permute.xlu0 %2120  ;;  %v2115_v56 = vpop.permute.xlu1 %2114 }
 0x8f3   :  { %v2165_v4 = vrot.slane %v2115_v56, %v3060_v30  ;;  %v2173_v26 = vrot.slane %v2121_v49, %v3060_v30 }
 0x8f5   :  { %v2222_v60 = vsel %vm1414_vm3, %v2165_v4, %v2161_v22 }
 0x8f6   :  { %v2124_v58 = vpop.permute.xlu0 %2123  ;;  %v2139_v3 = vpop.permute.xlu1 %2138  ;;  %v2223_v25 = vsel %vm1416_vm4, %v2169_v23, %v2222_v60 }
 0x8f7   :  { %v2177_v21 = vrot.slane %v2124_v58, %v3060_v30  ;;  %v2224_v36 = vsel %vm1418_vm5, %v2173_v26, %v2223_v25  ;;  %v2197_v41 = vrot.slane %v2139_v3, %v3060_v30 }
 0x8f9   :  { %v2225_v8 = vsel %vm1420_vm6, %v2177_v21, %v2224_v36 }
 0x8fa   :  { %v2127_v17 = vpop.permute.xlu0 %2126  ;;  %v2142_v6 = vpop.permute.xlu1 %2141 }
 0x8fb   :  { %v2181_v7 = vrot.slane %v2127_v17, %v3060_v30  ;;  %v2201_v46 = vrot.slane %v2142_v6, %v3060_v30 }
 0x8fd   :  { %v2226_v48 = vsel %vm1422_vm7, %v2181_v7, %v2225_v8 }
 0x8fe   :  { %v2136_v24 = vpop.permute.xlu0 %2135  ;;  %v2145_v51 = vpop.permute.xlu1 %2144 }
 0x8ff   :  { %v2193_v32 = vrot.slane %v2136_v24, %v3060_v30  ;;  %v2205_v19 = vrot.slane %v2145_v51, %v3060_v30 }
 0x901   :  { %v2229_v44 = vsel %vm1414_vm3, %v2197_v41, %v2193_v32 }
 0x902   :  { %v2130_v34 = vpop.permute.xlu0 %2129  ;;  %v2148_v35 = vpop.permute.xlu1 %2147  ;;  %v2230_v50 = vsel %vm1416_vm4, %v2201_v46, %v2229_v44 }
 0x903   :  { %v2185_v42 = vrot.slane %v2130_v34, %v3060_v30  ;;  %v2209_v53 = vrot.slane %v2148_v35, %v3060_v30  ;;  %v2231_v2 = vsel %vm1418_vm5, %v2205_v19, %v2230_v50  ;;  %v2294_v35 = vsel %vm1437_vm10, %v3345_v63, %v3359_v39 }
 0x905   :  { %v2227_v52 = vsel %vm1424_vm8, %v2185_v42, %v2226_v48  ;;  %v2232_v13 = vsel %vm1420_vm6, %v2209_v53, %v2231_v2 }
 0x906   :  { %v2133_v47 = vpop.permute.xlu0 %2132  ;;  %v2151_v27 = vpop.permute.xlu1 %2150 }
 0x907   :  { %v2189_v10 = vrot.slane %v2133_v47, %v3060_v30  ;;  %v2213_v16 = vrot.slane %v2151_v27, %v3060_v30 }
 0x909   :  { %v2228_v62 = vsel %vm1426_vm9, %v2189_v10, %v2227_v52  ;;  %v2233_v12 = vsel %vm1422_vm7, %v2213_v16, %v2232_v13 }
 0x90a   :  { %v2154_v55 = vpop.permute.xlu1 %2153  ;;  %v2238_v28 = vsel %vm1437_vm10, %v2228_v62, inf }
 0x90b   :  { %2239 = vmin.xlane.f32.xlu0 %v2238_v28  ;;  %v2217_v59 = vrot.slane %v2154_v55, %v3060_v30 }
 0x90d   :  { %v2234_v0 = vsel %vm1424_vm8, %v2217_v59, %v2233_v12 }
 0x90e   :  { %v2157_v29 = vpop.permute.xlu1 %2156 }
 0x90f   :  { %v2221_v20 = vrot.slane %v2157_v29, %v3060_v30 }
 0x911   :  { %v2235_v9 = vsel %vm1426_vm9, %v2221_v20, %v2234_v0 }
 0x912   :  { %v2241_v61 = vsel %vm1437_vm10, %v2235_v9, inf }
 0x913   :  { %2242 = vmin.xlane.f32.xlu1 %v2241_v61 }
 0x998   :  { %v2240_v31 = vpop.xlane.xlu0 %2239 }
 0x999   :  { %vm2244_vm3 = vcmp.eq.f32.partialorder %v3356_v11, %v2240_v31 }
 0x99a   :  { %v2246_v5 = vsel %vm2244_vm3, -inf, %v3345_v63 }
 0x99b   :  { %v2248_v33 = vsel %vm1437_vm10, %v2246_v5, -inf }
 0x99c   :  { %2249 = vmax.xlane.f32.xlu0 %v2248_v33 }
 0x9a0   :  { %v2243_v54 = vpop.xlane.xlu1 %2242 }
 0x9a1   :  { %vm2245_vm4 = vcmp.eq.f32.partialorder %v3356_v11, %v2243_v54 }
 0x9a2   :  { %v2247_v30 = vsel %vm2245_vm4, -inf, %v3351_v43 }
 0x9a3   :  { %v2251_v37 = vsel %vm1437_vm10, %v2247_v30, -inf }
 0x9a4   :  { %2252 = vmax.xlane.f32.xlu0 %v2251_v37 }
 0xa29   :  { %v2250_v15 = vpop.xlane.xlu0 %2249 }
 0xa2a   :  { %vm2254_vm5 = vcmp.eq.f32.partialorder %v2246_v5, %v2250_v15  ;;  %v2297_v36 = vsel %vm2296_vm14, %v2294_v35, %v2250_v15 }
 0xa2b   :  { %v2256_v18 = vsel %vm2254_vm5, %v3356_v11, 8.0 }
 0xa2c   :  { %v2258_v40 = vsel %vm1437_vm10, %v2256_v18, inf }
 0xa2d   :  { %2259 = vmin.xlane.f32.xlu1 %v2258_v40 }
 0xa31   :  { %v2253_v38 = vpop.xlane.xlu0 %2252 }
 0xa32   :  { %vm2255_vm6 = vcmp.eq.f32.partialorder %v2247_v30, %v2253_v38 }
 0xa33   :  { %v2257_v1 = vsel %vm2255_vm6, %v3356_v11, 8.0 }
 0xa34   :  { %v2261_v14 = vsel %vm1437_vm10, %v2257_v1, inf }
 0xa35   :  { %2262 = vmin.xlane.f32.xlu0 %v2261_v14 }
 0xaba   :  { %v2260_v57 = vpop.xlane.xlu1 %2259 }
 0xabb   :  { %vm2264_vm7 = vcmp.eq.f32.partialorder %v3356_v11, %v2260_v57 }
 0xabc   :  { %v2266_v49 = vsel %vm2264_vm7, -inf, %v2246_v5 }
 0xabd   :  { %v2268_v56 = vsel %vm1437_vm10, %v2266_v49, -inf }
 0xabe   :  { %2269 = vmax.xlane.f32.xlu1 %v2268_v56 }
 0xac2   :  { %v2263_v58 = vpop.xlane.xlu0 %2262 }
 0xac3   :  { %vm2265_vm8 = vcmp.eq.f32.partialorder %v3356_v11, %v2263_v58 }
 0xac4   :  { %v2267_v3 = vsel %vm2265_vm8, -inf, %v2247_v30 }
 0xac5   :  { %v2271_v4 = vsel %vm1437_vm10, %v2267_v3, -inf }
 0xac6   :  { %2272 = vmax.xlane.f32.xlu0 %v2271_v4 }
 0xb4b   :  { %v2270_v17 = vpop.xlane.xlu1 %2269 }
 0xb4c   :  { %vm2274_vm9 = vcmp.eq.f32.partialorder %v2266_v49, %v2270_v17  ;;  %v2300_v41 = vsel %vm2299_vm15, %v2297_v36, %v2270_v17 }
 0xb4d   :  { %v2276_v6 = vsel %vm2274_vm9, %v3356_v11, 8.0 }
 0xb4e   :  { %v2278_v22 = vsel %vm1437_vm10, %v2276_v6, inf }
 0xb4f   :  { %2279 = vmin.xlane.f32.xlu1 %v2278_v22 }
 0xb53   :  { %v2273_v60 = vpop.xlane.xlu0 %2272 }
 0xb54   :  { %vm2275_vm11 = vcmp.eq.f32.partialorder %v2267_v3, %v2273_v60 }
 0xb55   :  { %v2277_v23 = vsel %vm2275_vm11, %v3356_v11, 8.0 }
 0xb56   :  { %v2281_v24 = vsel %vm1437_vm10, %v2277_v23, inf }
 0xb57   :  { %2282 = vmin.xlane.f32.xlu0 %v2281_v24 }
 0xbdc   :  { %v2280_v51 = vpop.xlane.xlu1 %2279 }
 0xbdd   :  { %vm2284_vm12 = vcmp.eq.f32.partialorder %v3356_v11, %v2280_v51 }
 0xbde   :  { %v2286_v25 = vsel %vm2284_vm12, -inf, %v2266_v49 }
 0xbdf   :  { %v2288_v26 = vsel %vm1437_vm10, %v2286_v25, -inf }
 0xbe0   :  { %2289 = vmax.xlane.f32.xlu1 %v2288_v26 }
 0xbe4   :  { %v2283_v32 = vpop.xlane.xlu0 %2282 }
 0xbe5   :  { %vm2285_vm13 = vcmp.eq.f32.partialorder %v3356_v11, %v2283_v32  ;;  %v2295_v11 = vsel %vm1437_vm10, %v3351_v43, %v3361_v45 }
 0xbe6   :  { %v2287_v21 = vsel %vm2285_vm13, -inf, %v2267_v3  ;;  %v2298_v44 = vsel %vm2296_vm14, %v2295_v11, %v2253_v38 }
 0xbe7   :  { %v2291_v34 = vsel %vm1437_vm10, %v2287_v21, -inf  ;;  %v2301_v8 = vsel %vm2299_vm15, %v2298_v44, %v2273_v60 }
 0xbe8   :  { %2292 = vmax.xlane.f32.xlu0 %v2291_v34 }
 0xc6d   :  { %v2290_v7 = vpop.xlane.xlu1 %2289 }
 0xc6e   :  { %v2303_v42 = vsel %vm2302_vm0, %v2300_v41, %v2290_v7 }
 0xc6f   :  { %2306 = vst.msk [vmem:[%s3482_s5] sm:$0xff] %vm2305_vm1, %v2303_v42 }
 0xc75   :  { %v2293_v46 = vpop.xlane.xlu0 %2292 }
 0xc76   :  { %v2304_v47 = vsel %vm2302_vm0, %v2301_v8, %v2293_v46 }
 0xc77   :  { %2307 = vst.msk [vmem:[%s3482_s5 + $0x8] sm:$0xff] %vm2305_vm1, %v2304_v47 }

</bundles_post_ra>
